<compile_context>
chip_gen: v7x
topology: tpu7x:2x2x1
jax: 0.10.0
libtpu: 0.0.40
codegen_flags: <defaults>
</compile_context>

<pallas_src>
import functools

import jax
import jax.numpy as jnp
from jax.experimental import pallas as pl
from jax.experimental.pallas import tpu as pltpu


LANE = 128


def _round_up(x, m):
    return ((x + m - 1) // m) * m


# ----------------------------- Pallas kernels ------------------------------


def _mm_kernel(a_ref, b_ref, bias_ref, o_ref, *, relu):
    # bf16 x bf16 -> f32 accumulate on the MXU; f32 epilogue.
    acc = jnp.dot(a_ref[...], b_ref[...], preferred_element_type=jnp.float32)
    acc = acc + bias_ref[...]
    if relu:
        acc = jnp.maximum(acc, 0.0)
    o_ref[...] = acc


def _mm_res_kernel(a_ref, b_ref, bias_ref, res_ref, o_ref, *, relu):
    acc = jnp.dot(a_ref[...], b_ref[...], preferred_element_type=jnp.float32)
    acc = acc + bias_ref[...] + res_ref[...]
    if relu:
        acc = jnp.maximum(acc, 0.0)
    o_ref[...] = acc


def _max4_kernel(a_ref, b_ref, c_ref, d_ref, o_ref):
    o_ref[...] = jnp.maximum(
        jnp.maximum(a_ref[...], b_ref[...]),
        jnp.maximum(c_ref[...], d_ref[...]),
    )


# ------------------------------ kernel wrappers -----------------------------


def matmul_bias_act(a, b, bias, residual=None, relu=True, tm_max=1024):
    """out = act(a @ b + bias [+ residual]); a:[M,K] f32, b:[K,N] f32, bias:[N].

    Internally pads N to 128 lanes (lane-dense stores / full MXU columns),
    pads K to a multiple of 8 sublanes, casts A/B to bf16, and tiles M.
    """
    M, K = a.shape
    Kb, N = b.shape
    assert Kb == K
    K_pad = _round_up(K, 8)
    N_pad = _round_up(N, LANE)
    tm = min(tm_max, _round_up(M, 8))
    M_pad = _round_up(M, tm)

    a_p = jnp.pad(a, ((0, M_pad - M), (0, K_pad - K))).astype(jnp.bfloat16)
    b_p = jnp.pad(b, ((0, K_pad - K), (0, N_pad - N))).astype(jnp.bfloat16)
    bias_p = jnp.pad(bias.astype(jnp.float32), (0, N_pad - N)).reshape(1, N_pad)

    grid = (M_pad // tm,)
    spec_a = pl.BlockSpec((tm, K_pad), lambda i: (i, 0))
    spec_b = pl.BlockSpec((K_pad, N_pad), lambda i: (0, 0))
    spec_bias = pl.BlockSpec((1, N_pad), lambda i: (0, 0))
    spec_o = pl.BlockSpec((tm, N_pad), lambda i: (i, 0))

    bytes_accessed = (a_p.size * 2 + b_p.size * 2 + bias_p.size * 4
                      + M_pad * N_pad * 4)
    args = [a_p, b_p, bias_p]
    in_specs = [spec_a, spec_b, spec_bias]
    if residual is None:
        kern = functools.partial(_mm_kernel, relu=relu)
    else:
        kern = functools.partial(_mm_res_kernel, relu=relu)
        res_p = jnp.pad(residual.astype(jnp.float32),
                        ((0, M_pad - M), (0, N_pad - N)))
        args.append(res_p)
        in_specs.append(pl.BlockSpec((tm, N_pad), lambda i: (i, 0)))
        bytes_accessed += res_p.size * 4

    out = pl.pallas_call(
        kern,
        out_shape=jax.ShapeDtypeStruct((M_pad, N_pad), jnp.float32),
        grid=grid,
        in_specs=in_specs,
        out_specs=spec_o,
        compiler_params=pltpu.CompilerParams(
            dimension_semantics=("parallel",),
            vmem_limit_bytes=48 * 1024 * 1024),
        cost_estimate=pl.CostEstimate(
            flops=2 * M_pad * K_pad * N_pad,
            transcendentals=0,
            bytes_accessed=int(bytes_accessed)),
    )(*args)
    return out[:M, :N]


def maxpool2x2(x):
    """2x2 stride-2 max pool on NHWC via a tiled, lane-dense max-of-4 kernel."""
    N, H, W, C = x.shape
    Ho, Wo = H // 2, W // 2
    views = [
        x[:, di:2 * Ho:2, dj:2 * Wo:2, :]
        for di in (0, 1) for dj in (0, 1)
    ]
    total = N * Ho * Wo * C
    rows = -(-total // LANE)
    tile_rows = min(512, _round_up(rows, 8))
    rows_pad = _round_up(rows, tile_rows)
    pad_elems = rows_pad * LANE - total

    def prep(v):
        f = v.reshape(-1)
        if pad_elems:
            f = jnp.concatenate(
                [f, jnp.zeros((pad_elems,), f.dtype)])
        return f.reshape(rows_pad, LANE)

    flats = [prep(v) for v in views]
    spec = pl.BlockSpec((tile_rows, LANE), lambda i: (i, 0))
    out = pl.pallas_call(
        _max4_kernel,
        out_shape=jax.ShapeDtypeStruct((rows_pad, LANE), x.dtype),
        grid=(rows_pad // tile_rows,),
        in_specs=[spec] * 4,
        out_specs=spec,
        compiler_params=pltpu.CompilerParams(
            dimension_semantics=("parallel",)),
    )(*flats)
    return out.reshape(-1)[:total].reshape(N, Ho, Wo, C)


# ------------------------------ conv / blocks -------------------------------


def _im2col(x, kh, kw, stride, padding):
    """x: [N,H,W,C] -> patches [N*Hout*Wout, kh*kw*C] (glue, plain JAX)."""
    N, H, W, C = x.shape
    xp = jnp.pad(x, ((0, 0), (padding, padding), (padding, padding), (0, 0)))
    Hout = (H + 2 * padding - kh) // stride + 1
    Wout = (W + 2 * padding - kw) // stride + 1
    cols = []
    for i in range(kh):
        for j in range(kw):
            cols.append(
                xp[:, i:i + stride * Hout:stride, j:j + stride * Wout:stride, :])
    p = jnp.stack(cols, axis=3)  # [N, Hout, Wout, kh*kw, C]
    return p.reshape(N * Hout * Wout, kh * kw * C), (N, Hout, Wout)


def conv_bn(x, w_hwio, scale, bias, stride, padding, relu, residual=None):
    """Conv2d + folded BatchNorm (+ residual) (+ ReLU).  x: NHWC."""
    kh, kw, cin, cout = w_hwio.shape
    a, (N, Hout, Wout) = _im2col(x, kh, kw, stride, padding)
    w_folded = (w_hwio * scale.reshape(1, 1, 1, cout)).reshape(kh * kw * cin, cout)
    res_flat = None if residual is None else residual.reshape(
        N * Hout * Wout, cout)
    out = matmul_bias_act(a, w_folded, bias, residual=res_flat, relu=relu)
    return out.reshape(N, Hout, Wout, cout)


def basic_block(x, p, stride):
    """ResNet BasicBlock: conv-bn-relu, conv-bn, add shortcut, relu."""
    if "down" in p:
        sc = conv_bn(x, p["down"]["w"], p["down"]["scale"], p["down"]["bias"],
                     stride=stride, padding=0, relu=False)
    else:
        sc = x
    h = conv_bn(x, p["conv1"]["w"], p["conv1"]["scale"], p["conv1"]["bias"],
                stride=stride, padding=1, relu=True)
    # second conv fuses residual add + final ReLU in the matmul kernel epilogue
    return conv_bn(h, p["conv2"]["w"], p["conv2"]["scale"], p["conv2"]["bias"],
                   stride=1, padding=1, relu=True, residual=sc)


# ------------------------------ params & model ------------------------------


def _init_conv(key, kh, kw, cin, cout):
    kw_, kb = jax.random.split(key)
    fan_in = kh * kw * cin
    w = jax.random.normal(kw_, (kh, kw, cin, cout), jnp.float32) * (2.0 / fan_in) ** 0.5
    scale = 1.0 + 0.1 * jax.random.normal(kb, (cout,), jnp.float32)
    bias = 0.05 * jax.random.normal(jax.random.fold_in(kb, 1), (cout,), jnp.float32)
    return {"w": w, "scale": scale, "bias": bias}


def init_params(key):
    ks = jax.random.split(key, 11)
    return {
        "layer0": _init_conv(ks[0], 3, 3, 3, 16),
        "layer1": {"conv1": _init_conv(ks[1], 3, 3, 16, 16),
                   "conv2": _init_conv(ks[2], 3, 3, 16, 16)},
        "layer2": {"conv1": _init_conv(ks[3], 3, 3, 16, 32),
                   "conv2": _init_conv(ks[4], 3, 3, 32, 32),
                   "down": _init_conv(ks[5], 1, 1, 16, 32)},
        "layer3": {"conv1": _init_conv(ks[6], 3, 3, 32, 64),
                   "conv2": _init_conv(ks[7], 3, 3, 64, 64),
                   "down": _init_conv(ks[8], 1, 1, 32, 64)},
        "layer4": {"conv1": _init_conv(ks[9], 3, 3, 64, 64),
                   "conv2": _init_conv(ks[10], 3, 3, 64, 64)},
    }


def cotraining_forward(x_nchw, params):
    # layout: external NCHW (PyTorch) <-> internal NHWC
    x = jnp.transpose(x_nchw, (0, 2, 3, 1))
    # layer0: conv3x3 + BN(folded) + ReLU + maxpool 2x2/2
    p0 = params["layer0"]
    x = conv_bn(x, p0["w"], p0["scale"], p0["bias"], stride=1, padding=1, relu=True)
    x = maxpool2x2(x)
    x = basic_block(x, params["layer1"], stride=1)
    x = basic_block(x, params["layer2"], stride=2)
    x = basic_block(x, params["layer3"], stride=2)
    if params.get("layer4") is not None:  # mirrors `if self._model.layer4 is not None`
        x = basic_block(x, params["layer4"], stride=1)
    return jnp.transpose(x, (0, 3, 1, 2))  # back to NCHW feature map


# --------------------------------- driver -----------------------------------


if __name__ == "__main__":
    key = jax.random.PRNGKey(0)
    kx, kp = jax.random.split(key)
    # small stand-in for the 224x224 RGB input: batch=2, channels=3, spatial=16
    x = jax.random.normal(kx, (2, 3, 16, 16), jnp.float32)
    params = init_params(kp)

    out = jax.jit(cotraining_forward)(x, params)
    out = jax.block_until_ready(out)
    assert out.shape == (2, 64, 2, 2), out.shape
    assert jnp.all(jnp.isfinite(out))
    print("KERNEL_OK")
</pallas_src>

<mosaic_0001>
module attributes {stable_mosaic.version = 11 : i64} {
  func.func @_mm_kernel(%arg0: i32, %arg1: memref<512x32xbf16, #tpu.memory_space<vmem>>, %arg2: memref<32x128xbf16, #tpu.memory_space<vmem>>, %arg3: memref<1x128xf32, #tpu.memory_space<vmem>>, %arg4: memref<512x128xf32, #tpu.memory_space<vmem>>) attributes {dimension_semantics = [#tpu.dimension_semantics<parallel>], iteration_bounds = array<i64: 1>, scalar_prefetch = 0 : i64, scratch_operands = 0 : i64, tpu.core_type = #tpu.core_type<tc>, window_params = [{transform_indices = @transform_0, window_bounds = array<i64: 512, 32>}, {pipeline_mode = #tpu.pipeline_mode<synchronous>, transform_indices = @transform_1, window_bounds = array<i64: 32, 128>}, {pipeline_mode = #tpu.pipeline_mode<synchronous>, transform_indices = @transform_2, window_bounds = array<i64: 1, 128>}, {transform_indices = @transform_3, window_bounds = array<i64: 512, 128>}]} {
    %c0 = arith.constant 0 : index
    %c0_0 = arith.constant 0 : index
    %0 = vector.load %arg1[%c0, %c0_0] : memref<512x32xbf16, #tpu.memory_space<vmem>>, vector<512x32xbf16>
    %c0_1 = arith.constant 0 : index
    %c0_2 = arith.constant 0 : index
    %1 = vector.load %arg2[%c0_1, %c0_2] : memref<32x128xbf16, #tpu.memory_space<vmem>>, vector<32x128xbf16>
    %cst = arith.constant dense<0.000000e+00> : vector<512x128xf32>
    %2 = tpu.matmul %0, %1, %cst {dimension_numbers = #tpu.dot_dimension_numbers<[1], [0], [0], [1], [0, 0, 1, 1], [], []>} : vector<512x32xbf16>, vector<32x128xbf16>, vector<512x128xf32> -> vector<512x128xf32>
    %c0_3 = arith.constant 0 : index
    %c0_4 = arith.constant 0 : index
    %3 = vector.load %arg3[%c0_3, %c0_4] : memref<1x128xf32, #tpu.memory_space<vmem>>, vector<1x128xf32>
    %4 = vector.broadcast %3 : vector<1x128xf32> to vector<512x128xf32>
    %5 = arith.addf %2, %4 : vector<512x128xf32>
    %cst_5 = arith.constant 0.000000e+00 : f32
    %6 = vector.broadcast %cst_5 : f32 to vector<512x128xf32>
    %7 = arith.maximumf %5, %6 : vector<512x128xf32>
    %c0_6 = arith.constant 0 : index
    %c0_7 = arith.constant 0 : index
    %8 = vector.load %arg4[%c0_6, %c0_7] : memref<512x128xf32, #tpu.memory_space<vmem>>, vector<512x128xf32>
    tpu.vector_store %arg4[%c0_6, %c0_7], %7 {strides = array<i32>} : memref<512x128xf32, #tpu.memory_space<vmem>>, vector<512x128xf32>,
    return
  }
  func.func @transform_0(%arg0: i32) -> (i32, i32) {
    %c0_i32 = arith.constant 0 : i32
    %c0_i32_0 = arith.constant 0 : i32
    return %arg0, %c0_i32 : i32, i32
  }
  func.func @transform_1(%arg0: i32) -> (i32, i32) {
    %c0_i32 = arith.constant 0 : i32
    %c0_i32_0 = arith.constant 0 : i32
    %c0_i32_1 = arith.constant 0 : i32
    return %c0_i32, %c0_i32_0 : i32, i32
  }
  func.func @transform_2(%arg0: i32) -> (i32, i32) {
    %c0_i32 = arith.constant 0 : i32
    %c0_i32_0 = arith.constant 0 : i32
    %c0_i32_1 = arith.constant 0 : i32
    return %c0_i32, %c0_i32_0 : i32, i32
  }
  func.func @transform_3(%arg0: i32) -> (i32, i32) {
    %c0_i32 = arith.constant 0 : i32
    %c0_i32_0 = arith.constant 0 : i32
    return %arg0, %c0_i32 : i32, i32
  }
}

module attributes {stable_mosaic.version = 11 : i64} {
  func.func @_max4_kernel(%arg0: i32, %arg1: memref<16x128xf32, #tpu.memory_space<vmem>>, %arg2: memref<16x128xf32, #tpu.memory_space<vmem>>, %arg3: memref<16x128xf32, #tpu.memory_space<vmem>>, %arg4: memref<16x128xf32, #tpu.memory_space<vmem>>, %arg5: memref<16x128xf32, #tpu.memory_space<vmem>>) attributes {dimension_semantics = [#tpu.dimension_semantics<parallel>], iteration_bounds = array<i64: 1>, scalar_prefetch = 0 : i64, scratch_operands = 0 : i64, tpu.core_type = #tpu.core_type<tc>, window_params = [{transform_indices = @transform_0, window_bounds = array<i64: 16, 128>}, {transform_indices = @transform_1, window_bounds = array<i64: 16, 128>}, {transform_indices = @transform_2, window_bounds = array<i64: 16, 128>}, {transform_indices = @transform_3, window_bounds = array<i64: 16, 128>}, {transform_indices = @transform_4, window_bounds = array<i64: 16, 128>}]} {
    %c0 = arith.constant 0 : index
    %c0_0 = arith.constant 0 : index
    %0 = vector.load %arg1[%c0, %c0_0] : memref<16x128xf32, #tpu.memory_space<vmem>>, vector<16x128xf32>
    %c0_1 = arith.constant 0 : index
    %c0_2 = arith.constant 0 : index
    %1 = vector.load %arg2[%c0_1, %c0_2] : memref<16x128xf32, #tpu.memory_space<vmem>>, vector<16x128xf32>
    %2 = arith.maximumf %0, %1 : vector<16x128xf32>
    %c0_3 = arith.constant 0 : index
    %c0_4 = arith.constant 0 : index
    %3 = vector.load %arg3[%c0_3, %c0_4] : memref<16x128xf32, #tpu.memory_space<vmem>>, vector<16x128xf32>
    %c0_5 = arith.constant 0 : index
    %c0_6 = arith.constant 0 : index
    %4 = vector.load %arg4[%c0_5, %c0_6] : memref<16x128xf32, #tpu.memory_space<vmem>>, vector<16x128xf32>
    %5 = arith.maximumf %3, %4 : vector<16x128xf32>
    %6 = arith.maximumf %2, %5 : vector<16x128xf32>
    %c0_7 = arith.constant 0 : index
    %c0_8 = arith.constant 0 : index
    %7 = vector.load %arg5[%c0_7, %c0_8] : memref<16x128xf32, #tpu.memory_space<vmem>>, vector<16x128xf32>
    tpu.vector_store %arg5[%c0_7, %c0_8], %6 {strides = array<i32>} : memref<16x128xf32, #tpu.memory_space<vmem>>, vector<16x128xf32>,
    return
  }
  func.func @transform_0(%arg0: i32) -> (i32, i32) {
    %c0_i32 = arith.constant 0 : i32
    %c0_i32_0 = arith.constant 0 : i32
    return %arg0, %c0_i32 : i32, i32
  }
  func.func @transform_1(%arg0: i32) -> (i32, i32) {
    %c0_i32 = arith.constant 0 : i32
    %c0_i32_0 = arith.constant 0 : i32
    return %arg0, %c0_i32 : i32, i32
  }
  func.func @transform_2(%arg0: i32) -> (i32, i32) {
    %c0_i32 = arith.constant 0 : i32
    %c0_i32_0 = arith.constant 0 : i32
    return %arg0, %c0_i32 : i32, i32
  }
  func.func @transform_3(%arg0: i32) -> (i32, i32) {
    %c0_i32 = arith.constant 0 : i32
    %c0_i32_0 = arith.constant 0 : i32
    return %arg0, %c0_i32 : i32, i32
  }
  func.func @transform_4(%arg0: i32) -> (i32, i32) {
    %c0_i32 = arith.constant 0 : i32
    %c0_i32_0 = arith.constant 0 : i32
    return %arg0, %c0_i32 : i32, i32
  }
}

module attributes {stable_mosaic.version = 11 : i64} {
  func.func @_mm_kernel(%arg0: i32, %arg1: memref<128x144xbf16, #tpu.memory_space<vmem>>, %arg2: memref<144x128xbf16, #tpu.memory_space<vmem>>, %arg3: memref<1x128xf32, #tpu.memory_space<vmem>>, %arg4: memref<128x128xf32, #tpu.memory_space<vmem>>) attributes {dimension_semantics = [#tpu.dimension_semantics<parallel>], iteration_bounds = array<i64: 1>, scalar_prefetch = 0 : i64, scratch_operands = 0 : i64, tpu.core_type = #tpu.core_type<tc>, window_params = [{transform_indices = @transform_0, window_bounds = array<i64: 128, 144>}, {pipeline_mode = #tpu.pipeline_mode<synchronous>, transform_indices = @transform_1, window_bounds = array<i64: 144, 128>}, {pipeline_mode = #tpu.pipeline_mode<synchronous>, transform_indices = @transform_2, window_bounds = array<i64: 1, 128>}, {transform_indices = @transform_3, window_bounds = array<i64: 128, 128>}]} {
    %c0 = arith.constant 0 : index
    %c0_0 = arith.constant 0 : index
    %0 = vector.load %arg1[%c0, %c0_0] : memref<128x144xbf16, #tpu.memory_space<vmem>>, vector<128x144xbf16>
    %c0_1 = arith.constant 0 : index
    %c0_2 = arith.constant 0 : index
    %1 = vector.load %arg2[%c0_1, %c0_2] : memref<144x128xbf16, #tpu.memory_space<vmem>>, vector<144x128xbf16>
    %cst = arith.constant dense<0.000000e+00> : vector<128x128xf32>
    %2 = tpu.matmul %0, %1, %cst {dimension_numbers = #tpu.dot_dimension_numbers<[1], [0], [0], [1], [0, 0, 1, 1], [], []>} : vector<128x144xbf16>, vector<144x128xbf16>, vector<128x128xf32> -> vector<128x128xf32>
    %c0_3 = arith.constant 0 : index
    %c0_4 = arith.constant 0 : index
    %3 = vector.load %arg3[%c0_3, %c0_4] : memref<1x128xf32, #tpu.memory_space<vmem>>, vector<1x128xf32>
    %4 = vector.broadcast %3 : vector<1x128xf32> to vector<128x128xf32>
    %5 = arith.addf %2, %4 : vector<128x128xf32>
    %cst_5 = arith.constant 0.000000e+00 : f32
    %6 = vector.broadcast %cst_5 : f32 to vector<128x128xf32>
    %7 = arith.maximumf %5, %6 : vector<128x128xf32>
    %c0_6 = arith.constant 0 : index
    %c0_7 = arith.constant 0 : index
    %8 = vector.load %arg4[%c0_6, %c0_7] : memref<128x128xf32, #tpu.memory_space<vmem>>, vector<128x128xf32>
    tpu.vector_store %arg4[%c0_6, %c0_7], %7 {strides = array<i32>} : memref<128x128xf32, #tpu.memory_space<vmem>>, vector<128x128xf32>,
    return
  }
  func.func @transform_0(%arg0: i32) -> (i32, i32) {
    %c0_i32 = arith.constant 0 : i32
    %c0_i32_0 = arith.constant 0 : i32
    return %arg0, %c0_i32 : i32, i32
  }
  func.func @transform_1(%arg0: i32) -> (i32, i32) {
    %c0_i32 = arith.constant 0 : i32
    %c0_i32_0 = arith.constant 0 : i32
    %c0_i32_1 = arith.constant 0 : i32
    return %c0_i32, %c0_i32_0 : i32, i32
  }
  func.func @transform_2(%arg0: i32) -> (i32, i32) {
    %c0_i32 = arith.constant 0 : i32
    %c0_i32_0 = arith.constant 0 : i32
    %c0_i32_1 = arith.constant 0 : i32
    return %c0_i32, %c0_i32_0 : i32, i32
  }
  func.func @transform_3(%arg0: i32) -> (i32, i32) {
    %c0_i32 = arith.constant 0 : i32
    %c0_i32_0 = arith.constant 0 : i32
    return %arg0, %c0_i32 : i32, i32
  }
}

module attributes {stable_mosaic.version = 11 : i64} {
  func.func @_mm_res_kernel(%arg0: i32, %arg1: memref<128x144xbf16, #tpu.memory_space<vmem>>, %arg2: memref<144x128xbf16, #tpu.memory_space<vmem>>, %arg3: memref<1x128xf32, #tpu.memory_space<vmem>>, %arg4: memref<128x128xf32, #tpu.memory_space<vmem>>, %arg5: memref<128x128xf32, #tpu.memory_space<vmem>>) attributes {dimension_semantics = [#tpu.dimension_semantics<parallel>], iteration_bounds = array<i64: 1>, scalar_prefetch = 0 : i64, scratch_operands = 0 : i64, tpu.core_type = #tpu.core_type<tc>, window_params = [{transform_indices = @transform_0, window_bounds = array<i64: 128, 144>}, {pipeline_mode = #tpu.pipeline_mode<synchronous>, transform_indices = @transform_1, window_bounds = array<i64: 144, 128>}, {pipeline_mode = #tpu.pipeline_mode<synchronous>, transform_indices = @transform_2, window_bounds = array<i64: 1, 128>}, {transform_indices = @transform_3, window_bounds = array<i64: 128, 128>}, {transform_indices = @transform_4, window_bounds = array<i64: 128, 128>}]} {
    %c0 = arith.constant 0 : index
    %c0_0 = arith.constant 0 : index
    %0 = vector.load %arg1[%c0, %c0_0] : memref<128x144xbf16, #tpu.memory_space<vmem>>, vector<128x144xbf16>
    %c0_1 = arith.constant 0 : index
    %c0_2 = arith.constant 0 : index
    %1 = vector.load %arg2[%c0_1, %c0_2] : memref<144x128xbf16, #tpu.memory_space<vmem>>, vector<144x128xbf16>
    %cst = arith.constant dense<0.000000e+00> : vector<128x128xf32>
    %2 = tpu.matmul %0, %1, %cst {dimension_numbers = #tpu.dot_dimension_numbers<[1], [0], [0], [1], [0, 0, 1, 1], [], []>} : vector<128x144xbf16>, vector<144x128xbf16>, vector<128x128xf32> -> vector<128x128xf32>
    %c0_3 = arith.constant 0 : index
    %c0_4 = arith.constant 0 : index
    %3 = vector.load %arg3[%c0_3, %c0_4] : memref<1x128xf32, #tpu.memory_space<vmem>>, vector<1x128xf32>
    %4 = vector.broadcast %3 : vector<1x128xf32> to vector<128x128xf32>
    %5 = arith.addf %2, %4 : vector<128x128xf32>
    %c0_5 = arith.constant 0 : index
    %c0_6 = arith.constant 0 : index
    %6 = vector.load %arg4[%c0_5, %c0_6] : memref<128x128xf32, #tpu.memory_space<vmem>>, vector<128x128xf32>
    %7 = arith.addf %5, %6 : vector<128x128xf32>
    %cst_7 = arith.constant 0.000000e+00 : f32
    %8 = vector.broadcast %cst_7 : f32 to vector<128x128xf32>
    %9 = arith.maximumf %7, %8 : vector<128x128xf32>
    %c0_8 = arith.constant 0 : index
    %c0_9 = arith.constant 0 : index
    %10 = vector.load %arg5[%c0_8, %c0_9] : memref<128x128xf32, #tpu.memory_space<vmem>>, vector<128x128xf32>
    tpu.vector_store %arg5[%c0_8, %c0_9], %9 {strides = array<i32>} : memref<128x128xf32, #tpu.memory_space<vmem>>, vector<128x128xf32>,
    return
  }
  func.func @transform_0(%arg0: i32) -> (i32, i32) {
    %c0_i32 = arith.constant 0 : i32
    %c0_i32_0 = arith.constant 0 : i32
    return %arg0, %c0_i32 : i32, i32
  }
  func.func @transform_1(%arg0: i32) -> (i32, i32) {
    %c0_i32 = arith.constant 0 : i32
    %c0_i32_0 = arith.constant 0 : i32
    %c0_i32_1 = arith.constant 0 : i32
    return %c0_i32, %c0_i32_0 : i32, i32
  }
  func.func @transform_2(%arg0: i32) -> (i32, i32) {
    %c0_i32 = arith.constant 0 : i32
    %c0_i32_0 = arith.constant 0 : i32
    %c0_i32_1 = arith.constant 0 : i32
    return %c0_i32, %c0_i32_0 : i32, i32
  }
  func.func @transform_3(%arg0: i32) -> (i32, i32) {
    %c0_i32 = arith.constant 0 : i32
    %c0_i32_0 = arith.constant 0 : i32
    return %arg0, %c0_i32 : i32, i32
  }
  func.func @transform_4(%arg0: i32) -> (i32, i32) {
    %c0_i32 = arith.constant 0 : i32
    %c0_i32_0 = arith.constant 0 : i32
    return %arg0, %c0_i32 : i32, i32
  }
}

module attributes {stable_mosaic.version = 11 : i64} {
  func.func @_mm_kernel(%arg0: i32, %arg1: memref<32x144xbf16, #tpu.memory_space<vmem>>, %arg2: memref<144x128xbf16, #tpu.memory_space<vmem>>, %arg3: memref<1x128xf32, #tpu.memory_space<vmem>>, %arg4: memref<32x128xf32, #tpu.memory_space<vmem>>) attributes {dimension_semantics = [#tpu.dimension_semantics<parallel>], iteration_bounds = array<i64: 1>, scalar_prefetch = 0 : i64, scratch_operands = 0 : i64, tpu.core_type = #tpu.core_type<tc>, window_params = [{transform_indices = @transform_0, window_bounds = array<i64: 32, 144>}, {pipeline_mode = #tpu.pipeline_mode<synchronous>, transform_indices = @transform_1, window_bounds = array<i64: 144, 128>}, {pipeline_mode = #tpu.pipeline_mode<synchronous>, transform_indices = @transform_2, window_bounds = array<i64: 1, 128>}, {transform_indices = @transform_3, window_bounds = array<i64: 32, 128>}]} {
    %c0 = arith.constant 0 : index
    %c0_0 = arith.constant 0 : index
    %0 = vector.load %arg1[%c0, %c0_0] : memref<32x144xbf16, #tpu.memory_space<vmem>>, vector<32x144xbf16>
    %c0_1 = arith.constant 0 : index
    %c0_2 = arith.constant 0 : index
    %1 = vector.load %arg2[%c0_1, %c0_2] : memref<144x128xbf16, #tpu.memory_space<vmem>>, vector<144x128xbf16>
    %cst = arith.constant dense<0.000000e+00> : vector<32x128xf32>
    %2 = tpu.matmul %0, %1, %cst {dimension_numbers = #tpu.dot_dimension_numbers<[1], [0], [0], [1], [0, 0, 1, 1], [], []>} : vector<32x144xbf16>, vector<144x128xbf16>, vector<32x128xf32> -> vector<32x128xf32>
    %c0_3 = arith.constant 0 : index
    %c0_4 = arith.constant 0 : index
    %3 = vector.load %arg3[%c0_3, %c0_4] : memref<1x128xf32, #tpu.memory_space<vmem>>, vector<1x128xf32>
    %4 = vector.broadcast %3 : vector<1x128xf32> to vector<32x128xf32>
    %5 = arith.addf %2, %4 : vector<32x128xf32>
    %cst_5 = arith.constant 0.000000e+00 : f32
    %6 = vector.broadcast %cst_5 : f32 to vector<32x128xf32>
    %7 = arith.maximumf %5, %6 : vector<32x128xf32>
    %c0_6 = arith.constant 0 : index
    %c0_7 = arith.constant 0 : index
    %8 = vector.load %arg4[%c0_6, %c0_7] : memref<32x128xf32, #tpu.memory_space<vmem>>, vector<32x128xf32>
    tpu.vector_store %arg4[%c0_6, %c0_7], %7 {strides = array<i32>} : memref<32x128xf32, #tpu.memory_space<vmem>>, vector<32x128xf32>,
    return
  }
  func.func @transform_0(%arg0: i32) -> (i32, i32) {
    %c0_i32 = arith.constant 0 : i32
    %c0_i32_0 = arith.constant 0 : i32
    return %arg0, %c0_i32 : i32, i32
  }
  func.func @transform_1(%arg0: i32) -> (i32, i32) {
    %c0_i32 = arith.constant 0 : i32
    %c0_i32_0 = arith.constant 0 : i32
    %c0_i32_1 = arith.constant 0 : i32
    return %c0_i32, %c0_i32_0 : i32, i32
  }
  func.func @transform_2(%arg0: i32) -> (i32, i32) {
    %c0_i32 = arith.constant 0 : i32
    %c0_i32_0 = arith.constant 0 : i32
    %c0_i32_1 = arith.constant 0 : i32
    return %c0_i32, %c0_i32_0 : i32, i32
  }
  func.func @transform_3(%arg0: i32) -> (i32, i32) {
    %c0_i32 = arith.constant 0 : i32
    %c0_i32_0 = arith.constant 0 : i32
    return %arg0, %c0_i32 : i32, i32
  }
}

module attributes {stable_mosaic.version = 11 : i64} {
  func.func @_mm_kernel(%arg0: i32, %arg1: memref<32x16xbf16, #tpu.memory_space<vmem>>, %arg2: memref<16x128xbf16, #tpu.memory_space<vmem>>, %arg3: memref<1x128xf32, #tpu.memory_space<vmem>>, %arg4: memref<32x128xf32, #tpu.memory_space<vmem>>) attributes {dimension_semantics = [#tpu.dimension_semantics<parallel>], iteration_bounds = array<i64: 1>, scalar_prefetch = 0 : i64, scratch_operands = 0 : i64, tpu.core_type = #tpu.core_type<tc>, window_params = [{transform_indices = @transform_0, window_bounds = array<i64: 32, 16>}, {pipeline_mode = #tpu.pipeline_mode<synchronous>, transform_indices = @transform_1, window_bounds = array<i64: 16, 128>}, {pipeline_mode = #tpu.pipeline_mode<synchronous>, transform_indices = @transform_2, window_bounds = array<i64: 1, 128>}, {transform_indices = @transform_3, window_bounds = array<i64: 32, 128>}]} {
    %c0 = arith.constant 0 : index
    %c0_0 = arith.constant 0 : index
    %0 = vector.load %arg1[%c0, %c0_0] : memref<32x16xbf16, #tpu.memory_space<vmem>>, vector<32x16xbf16>
    %c0_1 = arith.constant 0 : index
    %c0_2 = arith.constant 0 : index
    %1 = vector.load %arg2[%c0_1, %c0_2] : memref<16x128xbf16, #tpu.memory_space<vmem>>, vector<16x128xbf16>
    %cst = arith.constant dense<0.000000e+00> : vector<32x128xf32>
    %2 = tpu.matmul %0, %1, %cst {dimension_numbers = #tpu.dot_dimension_numbers<[1], [0], [0], [1], [0, 0, 1, 1], [], []>} : vector<32x16xbf16>, vector<16x128xbf16>, vector<32x128xf32> -> vector<32x128xf32>
    %c0_3 = arith.constant 0 : index
    %c0_4 = arith.constant 0 : index
    %3 = vector.load %arg3[%c0_3, %c0_4] : memref<1x128xf32, #tpu.memory_space<vmem>>, vector<1x128xf32>
    %4 = vector.broadcast %3 : vector<1x128xf32> to vector<32x128xf32>
    %5 = arith.addf %2, %4 : vector<32x128xf32>
    %c0_5 = arith.constant 0 : index
    %c0_6 = arith.constant 0 : index
    %6 = vector.load %arg4[%c0_5, %c0_6] : memref<32x128xf32, #tpu.memory_space<vmem>>, vector<32x128xf32>
    tpu.vector_store %arg4[%c0_5, %c0_6], %5 {strides = array<i32>} : memref<32x128xf32, #tpu.memory_space<vmem>>, vector<32x128xf32>,
    return
  }
  func.func @transform_0(%arg0: i32) -> (i32, i32) {
    %c0_i32 = arith.constant 0 : i32
    %c0_i32_0 = arith.constant 0 : i32
    return %arg0, %c0_i32 : i32, i32
  }
  func.func @transform_1(%arg0: i32) -> (i32, i32) {
    %c0_i32 = arith.constant 0 : i32
    %c0_i32_0 = arith.constant 0 : i32
    %c0_i32_1 = arith.constant 0 : i32
    return %c0_i32, %c0_i32_0 : i32, i32
  }
  func.func @transform_2(%arg0: i32) -> (i32, i32) {
    %c0_i32 = arith.constant 0 : i32
    %c0_i32_0 = arith.constant 0 : i32
    %c0_i32_1 = arith.constant 0 : i32
    return %c0_i32, %c0_i32_0 : i32, i32
  }
  func.func @transform_3(%arg0: i32) -> (i32, i32) {
    %c0_i32 = arith.constant 0 : i32
    %c0_i32_0 = arith.constant 0 : i32
    return %arg0, %c0_i32 : i32, i32
  }
}

module attributes {stable_mosaic.version = 11 : i64} {
  func.func @_mm_res_kernel(%arg0: i32, %arg1: memref<32x288xbf16, #tpu.memory_space<vmem>>, %arg2: memref<288x128xbf16, #tpu.memory_space<vmem>>, %arg3: memref<1x128xf32, #tpu.memory_space<vmem>>, %arg4: memref<32x128xf32, #tpu.memory_space<vmem>>, %arg5: memref<32x128xf32, #tpu.memory_space<vmem>>) attributes {dimension_semantics = [#tpu.dimension_semantics<parallel>], iteration_bounds = array<i64: 1>, scalar_prefetch = 0 : i64, scratch_operands = 0 : i64, tpu.core_type = #tpu.core_type<tc>, window_params = [{transform_indices = @transform_0, window_bounds = array<i64: 32, 288>}, {pipeline_mode = #tpu.pipeline_mode<synchronous>, transform_indices = @transform_1, window_bounds = array<i64: 288, 128>}, {pipeline_mode = #tpu.pipeline_mode<synchronous>, transform_indices = @transform_2, window_bounds = array<i64: 1, 128>}, {transform_indices = @transform_3, window_bounds = array<i64: 32, 128>}, {transform_indices = @transform_4, window_bounds = array<i64: 32, 128>}]} {
    %c0 = arith.constant 0 : index
    %c0_0 = arith.constant 0 : index
    %0 = vector.load %arg1[%c0, %c0_0] : memref<32x288xbf16, #tpu.memory_space<vmem>>, vector<32x288xbf16>
    %c0_1 = arith.constant 0 : index
    %c0_2 = arith.constant 0 : index
    %1 = vector.load %arg2[%c0_1, %c0_2] : memref<288x128xbf16, #tpu.memory_space<vmem>>, vector<288x128xbf16>
    %cst = arith.constant dense<0.000000e+00> : vector<32x128xf32>
    %2 = tpu.matmul %0, %1, %cst {dimension_numbers = #tpu.dot_dimension_numbers<[1], [0], [0], [1], [0, 0, 1, 1], [], []>} : vector<32x288xbf16>, vector<288x128xbf16>, vector<32x128xf32> -> vector<32x128xf32>
    %c0_3 = arith.constant 0 : index
    %c0_4 = arith.constant 0 : index
    %3 = vector.load %arg3[%c0_3, %c0_4] : memref<1x128xf32, #tpu.memory_space<vmem>>, vector<1x128xf32>
    %4 = vector.broadcast %3 : vector<1x128xf32> to vector<32x128xf32>
    %5 = arith.addf %2, %4 : vector<32x128xf32>
    %c0_5 = arith.constant 0 : index
    %c0_6 = arith.constant 0 : index
    %6 = vector.load %arg4[%c0_5, %c0_6] : memref<32x128xf32, #tpu.memory_space<vmem>>, vector<32x128xf32>
    %7 = arith.addf %5, %6 : vector<32x128xf32>
    %cst_7 = arith.constant 0.000000e+00 : f32
    %8 = vector.broadcast %cst_7 : f32 to vector<32x128xf32>
    %9 = arith.maximumf %7, %8 : vector<32x128xf32>
    %c0_8 = arith.constant 0 : index
    %c0_9 = arith.constant 0 : index
    %10 = vector.load %arg5[%c0_8, %c0_9] : memref<32x128xf32, #tpu.memory_space<vmem>>, vector<32x128xf32>
    tpu.vector_store %arg5[%c0_8, %c0_9], %9 {strides = array<i32>} : memref<32x128xf32, #tpu.memory_space<vmem>>, vector<32x128xf32>,
    return
  }
  func.func @transform_0(%arg0: i32) -> (i32, i32) {
    %c0_i32 = arith.constant 0 : i32
    %c0_i32_0 = arith.constant 0 : i32
    return %arg0, %c0_i32 : i32, i32
  }
  func.func @transform_1(%arg0: i32) -> (i32, i32) {
    %c0_i32 = arith.constant 0 : i32
    %c0_i32_0 = arith.constant 0 : i32
    %c0_i32_1 = arith.constant 0 : i32
    return %c0_i32, %c0_i32_0 : i32, i32
  }
  func.func @transform_2(%arg0: i32) -> (i32, i32) {
    %c0_i32 = arith.constant 0 : i32
    %c0_i32_0 = arith.constant 0 : i32
    %c0_i32_1 = arith.constant 0 : i32
    return %c0_i32, %c0_i32_0 : i32, i32
  }
  func.func @transform_3(%arg0: i32) -> (i32, i32) {
    %c0_i32 = arith.constant 0 : i32
    %c0_i32_0 = arith.constant 0 : i32
    return %arg0, %c0_i32 : i32, i32
  }
  func.func @transform_4(%arg0: i32) -> (i32, i32) {
    %c0_i32 = arith.constant 0 : i32
    %c0_i32_0 = arith.constant 0 : i32
    return %arg0, %c0_i32 : i32, i32
  }
}

module attributes {stable_mosaic.version = 11 : i64} {
  func.func @_mm_kernel(%arg0: i32, %arg1: memref<8x288xbf16, #tpu.memory_space<vmem>>, %arg2: memref<288x128xbf16, #tpu.memory_space<vmem>>, %arg3: memref<1x128xf32, #tpu.memory_space<vmem>>, %arg4: memref<8x128xf32, #tpu.memory_space<vmem>>) attributes {dimension_semantics = [#tpu.dimension_semantics<parallel>], iteration_bounds = array<i64: 1>, scalar_prefetch = 0 : i64, scratch_operands = 0 : i64, tpu.core_type = #tpu.core_type<tc>, window_params = [{transform_indices = @transform_0, window_bounds = array<i64: 8, 288>}, {pipeline_mode = #tpu.pipeline_mode<synchronous>, transform_indices = @transform_1, window_bounds = array<i64: 288, 128>}, {pipeline_mode = #tpu.pipeline_mode<synchronous>, transform_indices = @transform_2, window_bounds = array<i64: 1, 128>}, {transform_indices = @transform_3, window_bounds = array<i64: 8, 128>}]} {
    %c0 = arith.constant 0 : index
    %c0_0 = arith.constant 0 : index
    %0 = vector.load %arg1[%c0, %c0_0] : memref<8x288xbf16, #tpu.memory_space<vmem>>, vector<8x288xbf16>
    %c0_1 = arith.constant 0 : index
    %c0_2 = arith.constant 0 : index
    %1 = vector.load %arg2[%c0_1, %c0_2] : memref<288x128xbf16, #tpu.memory_space<vmem>>, vector<288x128xbf16>
    %cst = arith.constant dense<0.000000e+00> : vector<8x128xf32>
    %2 = tpu.matmul %0, %1, %cst {dimension_numbers = #tpu.dot_dimension_numbers<[1], [0], [0], [1], [0, 0, 1, 1], [], []>} : vector<8x288xbf16>, vector<288x128xbf16>, vector<8x128xf32> -> vector<8x128xf32>
    %c0_3 = arith.constant 0 : index
    %c0_4 = arith.constant 0 : index
    %3 = vector.load %arg3[%c0_3, %c0_4] : memref<1x128xf32, #tpu.memory_space<vmem>>, vector<1x128xf32>
    %4 = vector.broadcast %3 : vector<1x128xf32> to vector<8x128xf32>
    %5 = arith.addf %2, %4 : vector<8x128xf32>
    %cst_5 = arith.constant 0.000000e+00 : f32
    %6 = vector.broadcast %cst_5 : f32 to vector<8x128xf32>
    %7 = arith.maximumf %5, %6 : vector<8x128xf32>
    %c0_6 = arith.constant 0 : index
    %c0_7 = arith.constant 0 : index
    %8 = vector.load %arg4[%c0_6, %c0_7] : memref<8x128xf32, #tpu.memory_space<vmem>>, vector<8x128xf32>
    tpu.vector_store %arg4[%c0_6, %c0_7], %7 {strides = array<i32>} : memref<8x128xf32, #tpu.memory_space<vmem>>, vector<8x128xf32>,
    return
  }
  func.func @transform_0(%arg0: i32) -> (i32, i32) {
    %c0_i32 = arith.constant 0 : i32
    %c0_i32_0 = arith.constant 0 : i32
    return %arg0, %c0_i32 : i32, i32
  }
  func.func @transform_1(%arg0: i32) -> (i32, i32) {
    %c0_i32 = arith.constant 0 : i32
    %c0_i32_0 = arith.constant 0 : i32
    %c0_i32_1 = arith.constant 0 : i32
    return %c0_i32, %c0_i32_0 : i32, i32
  }
  func.func @transform_2(%arg0: i32) -> (i32, i32) {
    %c0_i32 = arith.constant 0 : i32
    %c0_i32_0 = arith.constant 0 : i32
    %c0_i32_1 = arith.constant 0 : i32
    return %c0_i32, %c0_i32_0 : i32, i32
  }
  func.func @transform_3(%arg0: i32) -> (i32, i32) {
    %c0_i32 = arith.constant 0 : i32
    %c0_i32_0 = arith.constant 0 : i32
    return %arg0, %c0_i32 : i32, i32
  }
}

module attributes {stable_mosaic.version = 11 : i64} {
  func.func @_mm_kernel(%arg0: i32, %arg1: memref<8x32xbf16, #tpu.memory_space<vmem>>, %arg2: memref<32x128xbf16, #tpu.memory_space<vmem>>, %arg3: memref<1x128xf32, #tpu.memory_space<vmem>>, %arg4: memref<8x128xf32, #tpu.memory_space<vmem>>) attributes {dimension_semantics = [#tpu.dimension_semantics<parallel>], iteration_bounds = array<i64: 1>, scalar_prefetch = 0 : i64, scratch_operands = 0 : i64, tpu.core_type = #tpu.core_type<tc>, window_params = [{transform_indices = @transform_0, window_bounds = array<i64: 8, 32>}, {pipeline_mode = #tpu.pipeline_mode<synchronous>, transform_indices = @transform_1, window_bounds = array<i64: 32, 128>}, {pipeline_mode = #tpu.pipeline_mode<synchronous>, transform_indices = @transform_2, window_bounds = array<i64: 1, 128>}, {transform_indices = @transform_3, window_bounds = array<i64: 8, 128>}]} {
    %c0 = arith.constant 0 : index
    %c0_0 = arith.constant 0 : index
    %0 = vector.load %arg1[%c0, %c0_0] : memref<8x32xbf16, #tpu.memory_space<vmem>>, vector<8x32xbf16>
    %c0_1 = arith.constant 0 : index
    %c0_2 = arith.constant 0 : index
    %1 = vector.load %arg2[%c0_1, %c0_2] : memref<32x128xbf16, #tpu.memory_space<vmem>>, vector<32x128xbf16>
    %cst = arith.constant dense<0.000000e+00> : vector<8x128xf32>
    %2 = tpu.matmul %0, %1, %cst {dimension_numbers = #tpu.dot_dimension_numbers<[1], [0], [0], [1], [0, 0, 1, 1], [], []>} : vector<8x32xbf16>, vector<32x128xbf16>, vector<8x128xf32> -> vector<8x128xf32>
    %c0_3 = arith.constant 0 : index
    %c0_4 = arith.constant 0 : index
    %3 = vector.load %arg3[%c0_3, %c0_4] : memref<1x128xf32, #tpu.memory_space<vmem>>, vector<1x128xf32>
    %4 = vector.broadcast %3 : vector<1x128xf32> to vector<8x128xf32>
    %5 = arith.addf %2, %4 : vector<8x128xf32>
    %c0_5 = arith.constant 0 : index
    %c0_6 = arith.constant 0 : index
    %6 = vector.load %arg4[%c0_5, %c0_6] : memref<8x128xf32, #tpu.memory_space<vmem>>, vector<8x128xf32>
    tpu.vector_store %arg4[%c0_5, %c0_6], %5 {strides = array<i32>} : memref<8x128xf32, #tpu.memory_space<vmem>>, vector<8x128xf32>,
    return
  }
  func.func @transform_0(%arg0: i32) -> (i32, i32) {
    %c0_i32 = arith.constant 0 : i32
    %c0_i32_0 = arith.constant 0 : i32
    return %arg0, %c0_i32 : i32, i32
  }
  func.func @transform_1(%arg0: i32) -> (i32, i32) {
    %c0_i32 = arith.constant 0 : i32
    %c0_i32_0 = arith.constant 0 : i32
    %c0_i32_1 = arith.constant 0 : i32
    return %c0_i32, %c0_i32_0 : i32, i32
  }
  func.func @transform_2(%arg0: i32) -> (i32, i32) {
    %c0_i32 = arith.constant 0 : i32
    %c0_i32_0 = arith.constant 0 : i32
    %c0_i32_1 = arith.constant 0 : i32
    return %c0_i32, %c0_i32_0 : i32, i32
  }
  func.func @transform_3(%arg0: i32) -> (i32, i32) {
    %c0_i32 = arith.constant 0 : i32
    %c0_i32_0 = arith.constant 0 : i32
    return %arg0, %c0_i32 : i32, i32
  }
}

module attributes {stable_mosaic.version = 11 : i64} {
  func.func @_mm_kernel(%arg0: i32, %arg1: memref<8x576xbf16, #tpu.memory_space<vmem>>, %arg2: memref<576x128xbf16, #tpu.memory_space<vmem>>, %arg3: memref<1x128xf32, #tpu.memory_space<vmem>>, %arg4: memref<8x128xf32, #tpu.memory_space<vmem>>) attributes {dimension_semantics = [#tpu.dimension_semantics<parallel>], iteration_bounds = array<i64: 1>, scalar_prefetch = 0 : i64, scratch_operands = 0 : i64, tpu.core_type = #tpu.core_type<tc>, window_params = [{transform_indices = @transform_0, window_bounds = array<i64: 8, 576>}, {pipeline_mode = #tpu.pipeline_mode<synchronous>, transform_indices = @transform_1, window_bounds = array<i64: 576, 128>}, {pipeline_mode = #tpu.pipeline_mode<synchronous>, transform_indices = @transform_2, window_bounds = array<i64: 1, 128>}, {transform_indices = @transform_3, window_bounds = array<i64: 8, 128>}]} {
    %c0 = arith.constant 0 : index
    %c0_0 = arith.constant 0 : index
    %0 = vector.load %arg1[%c0, %c0_0] : memref<8x576xbf16, #tpu.memory_space<vmem>>, vector<8x576xbf16>
    %c0_1 = arith.constant 0 : index
    %c0_2 = arith.constant 0 : index
    %1 = vector.load %arg2[%c0_1, %c0_2] : memref<576x128xbf16, #tpu.memory_space<vmem>>, vector<576x128xbf16>
    %cst = arith.constant dense<0.000000e+00> : vector<8x128xf32>
    %2 = tpu.matmul %0, %1, %cst {dimension_numbers = #tpu.dot_dimension_numbers<[1], [0], [0], [1], [0, 0, 1, 1], [], []>} : vector<8x576xbf16>, vector<576x128xbf16>, vector<8x128xf32> -> vector<8x128xf32>
    %c0_3 = arith.constant 0 : index
    %c0_4 = arith.constant 0 : index
    %3 = vector.load %arg3[%c0_3, %c0_4] : memref<1x128xf32, #tpu.memory_space<vmem>>, vector<1x128xf32>
    %4 = vector.broadcast %3 : vector<1x128xf32> to vector<8x128xf32>
    %5 = arith.addf %2, %4 : vector<8x128xf32>
    %cst_5 = arith.constant 0.000000e+00 : f32
    %6 = vector.broadcast %cst_5 : f32 to vector<8x128xf32>
    %7 = arith.maximumf %5, %6 : vector<8x128xf32>
    %c0_6 = arith.constant 0 : index
    %c0_7 = arith.constant 0 : index
    %8 = vector.load %arg4[%c0_6, %c0_7] : memref<8x128xf32, #tpu.memory_space<vmem>>, vector<8x128xf32>
    tpu.vector_store %arg4[%c0_6, %c0_7], %7 {strides = array<i32>} : memref<8x128xf32, #tpu.memory_space<vmem>>, vector<8x128xf32>,
    return
  }
  func.func @transform_0(%arg0: i32) -> (i32, i32) {
    %c0_i32 = arith.constant 0 : i32
    %c0_i32_0 = arith.constant 0 : i32
    return %arg0, %c0_i32 : i32, i32
  }
  func.func @transform_1(%arg0: i32) -> (i32, i32) {
    %c0_i32 = arith.constant 0 : i32
    %c0_i32_0 = arith.constant 0 : i32
    %c0_i32_1 = arith.constant 0 : i32
    return %c0_i32, %c0_i32_0 : i32, i32
  }
  func.func @transform_2(%arg0: i32) -> (i32, i32) {
    %c0_i32 = arith.constant 0 : i32
    %c0_i32_0 = arith.constant 0 : i32
    %c0_i32_1 = arith.constant 0 : i32
    return %c0_i32, %c0_i32_0 : i32, i32
  }
  func.func @transform_3(%arg0: i32) -> (i32, i32) {
    %c0_i32 = arith.constant 0 : i32
    %c0_i32_0 = arith.constant 0 : i32
    return %arg0, %c0_i32 : i32, i32
  }
}

module attributes {stable_mosaic.version = 11 : i64} {
  func.func @_mm_res_kernel(%arg0: i32, %arg1: memref<8x576xbf16, #tpu.memory_space<vmem>>, %arg2: memref<576x128xbf16, #tpu.memory_space<vmem>>, %arg3: memref<1x128xf32, #tpu.memory_space<vmem>>, %arg4: memref<8x128xf32, #tpu.memory_space<vmem>>, %arg5: memref<8x128xf32, #tpu.memory_space<vmem>>) attributes {dimension_semantics = [#tpu.dimension_semantics<parallel>], iteration_bounds = array<i64: 1>, scalar_prefetch = 0 : i64, scratch_operands = 0 : i64, tpu.core_type = #tpu.core_type<tc>, window_params = [{transform_indices = @transform_0, window_bounds = array<i64: 8, 576>}, {pipeline_mode = #tpu.pipeline_mode<synchronous>, transform_indices = @transform_1, window_bounds = array<i64: 576, 128>}, {pipeline_mode = #tpu.pipeline_mode<synchronous>, transform_indices = @transform_2, window_bounds = array<i64: 1, 128>}, {transform_indices = @transform_3, window_bounds = array<i64: 8, 128>}, {transform_indices = @transform_4, window_bounds = array<i64: 8, 128>}]} {
    %c0 = arith.constant 0 : index
    %c0_0 = arith.constant 0 : index
    %0 = vector.load %arg1[%c0, %c0_0] : memref<8x576xbf16, #tpu.memory_space<vmem>>, vector<8x576xbf16>
    %c0_1 = arith.constant 0 : index
    %c0_2 = arith.constant 0 : index
    %1 = vector.load %arg2[%c0_1, %c0_2] : memref<576x128xbf16, #tpu.memory_space<vmem>>, vector<576x128xbf16>
    %cst = arith.constant dense<0.000000e+00> : vector<8x128xf32>
    %2 = tpu.matmul %0, %1, %cst {dimension_numbers = #tpu.dot_dimension_numbers<[1], [0], [0], [1], [0, 0, 1, 1], [], []>} : vector<8x576xbf16>, vector<576x128xbf16>, vector<8x128xf32> -> vector<8x128xf32>
    %c0_3 = arith.constant 0 : index
    %c0_4 = arith.constant 0 : index
    %3 = vector.load %arg3[%c0_3, %c0_4] : memref<1x128xf32, #tpu.memory_space<vmem>>, vector<1x128xf32>
    %4 = vector.broadcast %3 : vector<1x128xf32> to vector<8x128xf32>
    %5 = arith.addf %2, %4 : vector<8x128xf32>
    %c0_5 = arith.constant 0 : index
    %c0_6 = arith.constant 0 : index
    %6 = vector.load %arg4[%c0_5, %c0_6] : memref<8x128xf32, #tpu.memory_space<vmem>>, vector<8x128xf32>
    %7 = arith.addf %5, %6 : vector<8x128xf32>
    %cst_7 = arith.constant 0.000000e+00 : f32
    %8 = vector.broadcast %cst_7 : f32 to vector<8x128xf32>
    %9 = arith.maximumf %7, %8 : vector<8x128xf32>
    %c0_8 = arith.constant 0 : index
    %c0_9 = arith.constant 0 : index
    %10 = vector.load %arg5[%c0_8, %c0_9] : memref<8x128xf32, #tpu.memory_space<vmem>>, vector<8x128xf32>
    tpu.vector_store %arg5[%c0_8, %c0_9], %9 {strides = array<i32>} : memref<8x128xf32, #tpu.memory_space<vmem>>, vector<8x128xf32>,
    return
  }
  func.func @transform_0(%arg0: i32) -> (i32, i32) {
    %c0_i32 = arith.constant 0 : i32
    %c0_i32_0 = arith.constant 0 : i32
    return %arg0, %c0_i32 : i32, i32
  }
  func.func @transform_1(%arg0: i32) -> (i32, i32) {
    %c0_i32 = arith.constant 0 : i32
    %c0_i32_0 = arith.constant 0 : i32
    %c0_i32_1 = arith.constant 0 : i32
    return %c0_i32, %c0_i32_0 : i32, i32
  }
  func.func @transform_2(%arg0: i32) -> (i32, i32) {
    %c0_i32 = arith.constant 0 : i32
    %c0_i32_0 = arith.constant 0 : i32
    %c0_i32_1 = arith.constant 0 : i32
    return %c0_i32, %c0_i32_0 : i32, i32
  }
  func.func @transform_3(%arg0: i32) -> (i32, i32) {
    %c0_i32 = arith.constant 0 : i32
    %c0_i32_0 = arith.constant 0 : i32
    return %arg0, %c0_i32 : i32, i32
  }
  func.func @transform_4(%arg0: i32) -> (i32, i32) {
    %c0_i32 = arith.constant 0 : i32
    %c0_i32_0 = arith.constant 0 : i32
    return %arg0, %c0_i32 : i32, i32
  }
}

module attributes {stable_mosaic.version = 11 : i64} {
  func.func @_mm_res_kernel(%arg0: i32, %arg1: memref<8x576xbf16, #tpu.memory_space<vmem>>, %arg2: memref<576x128xbf16, #tpu.memory_space<vmem>>, %arg3: memref<1x128xf32, #tpu.memory_space<vmem>>, %arg4: memref<8x128xf32, #tpu.memory_space<vmem>>, %arg5: memref<8x128xf32, #tpu.memory_space<vmem>>) attributes {dimension_semantics = [#tpu.dimension_semantics<parallel>], iteration_bounds = array<i64: 1>, scalar_prefetch = 0 : i64, scratch_operands = 0 : i64, tpu.core_type = #tpu.core_type<tc>, window_params = [{transform_indices = @transform_0, window_bounds = array<i64: 8, 576>}, {pipeline_mode = #tpu.pipeline_mode<synchronous>, transform_indices = @transform_1, window_bounds = array<i64: 576, 128>}, {pipeline_mode = #tpu.pipeline_mode<synchronous>, transform_indices = @transform_2, window_bounds = array<i64: 1, 128>}, {transform_indices = @transform_3, window_bounds = array<i64: 8, 128>}, {transform_indices = @transform_4, window_bounds = array<i64: 8, 128>}]} {
    %c0 = arith.constant 0 : index
    %c0_0 = arith.constant 0 : index
    %0 = vector.load %arg1[%c0, %c0_0] : memref<8x576xbf16, #tpu.memory_space<vmem>>, vector<8x576xbf16>
    %c0_1 = arith.constant 0 : index
    %c0_2 = arith.constant 0 : index
    %1 = vector.load %arg2[%c0_1, %c0_2] : memref<576x128xbf16, #tpu.memory_space<vmem>>, vector<576x128xbf16>
    %cst = arith.constant dense<0.000000e+00> : vector<8x128xf32>
    %2 = tpu.matmul %0, %1, %cst {dimension_numbers = #tpu.dot_dimension_numbers<[1], [0], [0], [1], [0, 0, 1, 1], [], []>} : vector<8x576xbf16>, vector<576x128xbf16>, vector<8x128xf32> -> vector<8x128xf32>
    %c0_3 = arith.constant 0 : index
    %c0_4 = arith.constant 0 : index
    %3 = vector.load %arg3[%c0_3, %c0_4] : memref<1x128xf32, #tpu.memory_space<vmem>>, vector<1x128xf32>
    %4 = vector.broadcast %3 : vector<1x128xf32> to vector<8x128xf32>
    %5 = arith.addf %2, %4 : vector<8x128xf32>
    %c0_5 = arith.constant 0 : index
    %c0_6 = arith.constant 0 : index
    %6 = vector.load %arg4[%c0_5, %c0_6] : memref<8x128xf32, #tpu.memory_space<vmem>>, vector<8x128xf32>
    %7 = arith.addf %5, %6 : vector<8x128xf32>
    %cst_7 = arith.constant 0.000000e+00 : f32
    %8 = vector.broadcast %cst_7 : f32 to vector<8x128xf32>
    %9 = arith.maximumf %7, %8 : vector<8x128xf32>
    %c0_8 = arith.constant 0 : index
    %c0_9 = arith.constant 0 : index
    %10 = vector.load %arg5[%c0_8, %c0_9] : memref<8x128xf32, #tpu.memory_space<vmem>>, vector<8x128xf32>
    tpu.vector_store %arg5[%c0_8, %c0_9], %9 {strides = array<i32>} : memref<8x128xf32, #tpu.memory_space<vmem>>, vector<8x128xf32>,
    return
  }
  func.func @transform_0(%arg0: i32) -> (i32, i32) {
    %c0_i32 = arith.constant 0 : i32
    %c0_i32_0 = arith.constant 0 : i32
    return %arg0, %c0_i32 : i32, i32
  }
  func.func @transform_1(%arg0: i32) -> (i32, i32) {
    %c0_i32 = arith.constant 0 : i32
    %c0_i32_0 = arith.constant 0 : i32
    %c0_i32_1 = arith.constant 0 : i32
    return %c0_i32, %c0_i32_0 : i32, i32
  }
  func.func @transform_2(%arg0: i32) -> (i32, i32) {
    %c0_i32 = arith.constant 0 : i32
    %c0_i32_0 = arith.constant 0 : i32
    %c0_i32_1 = arith.constant 0 : i32
    return %c0_i32, %c0_i32_0 : i32, i32
  }
  func.func @transform_3(%arg0: i32) -> (i32, i32) {
    %c0_i32 = arith.constant 0 : i32
    %c0_i32_0 = arith.constant 0 : i32
    return %arg0, %c0_i32 : i32, i32
  }
  func.func @transform_4(%arg0: i32) -> (i32, i32) {
    %c0_i32 = arith.constant 0 : i32
    %c0_i32_0 = arith.constant 0 : i32
    return %arg0, %c0_i32 : i32, i32
  }
}

</mosaic_0001>

<bundles_post_ra>
// kernel: cotraining_forward.13
= control target key start
LH: loop header
LB: loop body
LE: loop exit
PB: predicated region body
PF: predicated region fallthrough
CT: control target
= control target key end

     0   :  { %s92_s0 = inlined_call_operand.vmem [shape: f32[16,128], index: 0, kind: input, shape index: {}]   ;;  %s93_s1 = inlined_call_operand.vmem [shape: f32[16,128], index: 1, kind: input, shape index: {}]   ;;  %s94_s2 = inlined_call_operand.vmem [shape: f32[16,128], index: 2, kind: input, shape index: {}]   ;;  %s95_s3 = inlined_call_operand.vmem [shape: f32[16,128], index: 3, kind: input, shape index: {}]   ;;  %s96_s4 = inlined_call_operand.vmem [shape: f32[16,128], index: 4, kind: output, shape index: {}]  }
   0x1   :  { %v17_v0 = vld [vmem:[%s92_s0] sm:$0xff]  ;;  %v18_v5 = vld [vmem:[%s92_s0 + $0x8] sm:$0xff] }
   0x2   :  { %v19_v1 = vld [vmem:[%s93_s1] sm:$0xff]  ;;  %v20_v6 = vld [vmem:[%s93_s1 + $0x8] sm:$0xff] }
   0x3   :  { %v23_v2 = vld [vmem:[%s94_s2] sm:$0xff]  ;;  %v21_v3 = vmax.f32 %v17_v0, %v19_v1  ;;  %v22_v8 = vmax.f32 %v18_v5, %v20_v6  ;;  %v24_v9 = vld [vmem:[%s94_s2 + $0x8] sm:$0xff] }
   0x4   :  { %v25_v4 = vld [vmem:[%s95_s3] sm:$0xff]  ;;  %v26_v10 = vld [vmem:[%s95_s3 + $0x8] sm:$0xff] }
   0x5   :  { %v27_v7 = vmax.f32 %v23_v2, %v25_v4  ;;  %v28_v11 = vmax.f32 %v24_v9, %v26_v10 }
   0x7   :  { %v29_v12 = vmax.f32 %v21_v3, %v27_v7  ;;  %v30_v13 = vmax.f32 %v22_v8, %v28_v11 }
   0x9   :  { %31 = vst [vmem:[%s96_s4] sm:$0xff] %v29_v12  ;;  %32 = vst [vmem:[%s96_s4 + $0x8] sm:$0xff] %v30_v13 }

// kernel: cotraining_forward.12
= control target key start
LH: loop header
LB: loop body
LE: loop exit
PB: predicated region body
PF: predicated region fallthrough
CT: control target
= control target key end

     0   :  { %vm262_vm0 = vcmask 261120   ;;  %s1402_s1 = inlined_call_operand.vmem [shape: bf16[32,128], index: 1, kind: input, shape index: {}]   ;;  %s1403_s0 = inlined_call_operand.vmem [shape: bf16[512,32], index: 0, kind: input, shape index: {}]   ;;  %s1404_s2 = inlined_call_operand.vmem [shape: f32[1,128], index: 2, kind: input, shape index: {}]   ;;  %s1405_s3 = inlined_call_operand.vmem [shape: f32[512,128], index: 3, kind: output, shape index: {}]  }
   0x1   :  { %v953_v0 = vld [vmem:[%s1402_s1] sm:$0xff]   ;;  %v954_v1 = vld [vmem:[%s1402_s1 + $0x8] sm:$0xff]   ;;  %v959_v6 = vld [vmem:[%s1403_s0 + $0x10] sm:$0xff]  }
   0x2   :  { %881 = vmatprep.subr.bf16.mxu0 %v953_v0  ;;  %949 = vmatprep.subr.bf16.mxu1 %v953_v0  ;;  %v955_v2 = vld [vmem:[%s1403_s0] sm:$0xff]   ;;  %v957_v4 = vld [vmem:[%s1403_s0 + $0x8] sm:$0xff]   ;;  %v960_v7 = vld [vmem:[%s1403_s0 + $0x90] sm:$0xff]  }
   0x3   :  { %882 = vmatpush3.bf16.msra.mxu0 %v953_v0  ;;  %951 = vmatpush3.bf16.msra.mxu1 %v953_v0  ;;  %v956_v3 = vld [vmem:[%s1403_s0 + $0x80] sm:$0xff]   ;;  %v958_v5 = vld [vmem:[%s1403_s0 + $0x88] sm:$0xff]   ;;  %v961_v8 = vld [vmem:[%s1403_s0 + $0x18] sm:$0xff]  }
   0x4   :  { %883 = vmatprep.subr.bf16.mxu0 %v954_v1  ;;  %950 = vmatprep.subr.bf16.mxu1 %v954_v1  ;;  %v962_v9 = vld [vmem:[%s1403_s0 + $0x98] sm:$0xff]   ;;  %v963_v10 = vld [vmem:[%s1403_s0 + $0x20] sm:$0xff]   ;;  %v965_v12 = vld [vmem:[%s1403_s0 + $0x28] sm:$0xff]  }
   0x5   :  { %885 = vmatprep.mubr.msk.bf16.mxu0 %vm262_vm0, %v955_v2  ;;  %917 = vmatprep.mubr.msk.bf16.mxu1 %vm262_vm0, %v956_v3  ;;  %v964_v11 = vld [vmem:[%s1403_s0 + $0xa0] sm:$0xff]   ;;  %v966_v13 = vld [vmem:[%s1403_s0 + $0xa8] sm:$0xff]   ;;  %v967_v14 = vld [vmem:[%s1403_s0 + $0x30] sm:$0xff]  }
   0x6   :  { %v968_v15 = vld [vmem:[%s1403_s0 + $0xb0] sm:$0xff]   ;;  %v969_v16 = vld [vmem:[%s1403_s0 + $0x38] sm:$0xff]   ;;  %v971_v18 = vld [vmem:[%s1403_s0 + $0x40] sm:$0xff]  }
   0x7   :  { %884 = vmatpush3.bf16.msra.mxu0 %v954_v1  ;;  %952 = vmatpush3.bf16.msra.mxu1 %v954_v1  ;;  %v970_v17 = vld [vmem:[%s1403_s0 + $0xb8] sm:$0xff]   ;;  %v972_v19 = vld [vmem:[%s1403_s0 + $0xc0] sm:$0xff]   ;;  %v973_v20 = vld [vmem:[%s1403_s0 + $0x48] sm:$0xff]  }
   0x8   :  { %v974_v21 = vld [vmem:[%s1403_s0 + $0xc8] sm:$0xff]   ;;  %v975_v22 = vld [vmem:[%s1403_s0 + $0x50] sm:$0xff]   ;;  %v977_v24 = vld [vmem:[%s1403_s0 + $0x58] sm:$0xff]  }
   0x9   :  { %v976_v23 = vld [vmem:[%s1403_s0 + $0xd0] sm:$0xff]   ;;  %v978_v25 = vld [vmem:[%s1403_s0 + $0xd8] sm:$0xff]   ;;  %v979_v26 = vld [vmem:[%s1403_s0 + $0x60] sm:$0xff]  }
   0xa   :  { %886 = vmatmul.mubr.msk.bf16.vlgmr.msra.gmra.mrb[0].mxu0 %vm262_vm0, %v957_v4  ;;  %918 = vmatmul.mubr.msk.bf16.vlgmr.msra.gmra.mrb[0].mxu1 %vm262_vm0, %v958_v5  ;;  %v980_v27 = vld [vmem:[%s1403_s0 + $0xe0] sm:$0xff]   ;;  %v981_v28 = vld [vmem:[%s1403_s0 + $0x68] sm:$0xff]   ;;  %v983_v30 = vld [vmem:[%s1403_s0 + $0x70] sm:$0xff]  }
   0xb   :  { %889 = vmatprep.mubr.msk.bf16.mxu0 %vm262_vm0, %v959_v6  ;;  %921 = vmatprep.mubr.msk.bf16.mxu1 %vm262_vm0, %v960_v7  ;;  %v982_v29 = vld [vmem:[%s1403_s0 + $0xe8] sm:$0xff]   ;;  %v984_v31 = vld [vmem:[%s1403_s0 + $0xf0] sm:$0xff]   ;;  %v985_v32 = vld [vmem:[%s1403_s0 + $0x78] sm:$0xff]  }
   0xc   :  { %v986_v33 = vld [vmem:[%s1403_s0 + $0xf8] sm:$0xff]   ;;  %v1144_v34 = vld [vmem:[%s1404_s2] ss:$0 sm:$0xff] }
  0x12   :  { %890 = vmatmul.mubr.msk.bf16.gmra.mrb[4].mxu0 %vm262_vm0, %v961_v8  ;;  %922 = vmatmul.mubr.msk.bf16.gmra.mrb[4].mxu1 %vm262_vm0, %v962_v9 }
  0x13   :  { %893 = vmatprep.mubr.msk.bf16.mxu0 %vm262_vm0, %v963_v10  ;;  %925 = vmatprep.mubr.msk.bf16.mxu1 %vm262_vm0, %v964_v11 }
  0x1a   :  { %894 = vmatmul.mubr.msk.bf16.gmra.mrb[8].mxu0 %vm262_vm0, %v965_v12  ;;  %926 = vmatmul.mubr.msk.bf16.gmra.mrb[8].mxu1 %vm262_vm0, %v966_v13 }
  0x1b   :  { %897 = vmatprep.mubr.msk.bf16.mxu0 %vm262_vm0, %v967_v14  ;;  %929 = vmatprep.mubr.msk.bf16.mxu1 %vm262_vm0, %v968_v15 }
  0x22   :  { %898 = vmatmul.mubr.msk.bf16.gmra.mrb[12].mxu0 %vm262_vm0, %v969_v16  ;;  %930 = vmatmul.mubr.msk.bf16.gmra.mrb[12].mxu1 %vm262_vm0, %v970_v17 }
  0x23   :  { %901 = vmatprep.mubr.msk.bf16.mxu0 %vm262_vm0, %v971_v18  ;;  %933 = vmatprep.mubr.msk.bf16.mxu1 %vm262_vm0, %v972_v19 }
  0x2a   :  { %902 = vmatmul.mubr.msk.bf16.gmra.mrb[16].mxu0 %vm262_vm0, %v973_v20  ;;  %934 = vmatmul.mubr.msk.bf16.gmra.mrb[16].mxu1 %vm262_vm0, %v974_v21 }
  0x2b   :  { %905 = vmatprep.mubr.msk.bf16.mxu0 %vm262_vm0, %v975_v22  ;;  %937 = vmatprep.mubr.msk.bf16.mxu1 %vm262_vm0, %v976_v23 }
  0x32   :  { %906 = vmatmul.mubr.msk.bf16.gmra.mrb[20].mxu0 %vm262_vm0, %v977_v24  ;;  %938 = vmatmul.mubr.msk.bf16.gmra.mrb[20].mxu1 %vm262_vm0, %v978_v25 }
  0x33   :  { %909 = vmatprep.mubr.msk.bf16.mxu0 %vm262_vm0, %v979_v26  ;;  %941 = vmatprep.mubr.msk.bf16.mxu1 %vm262_vm0, %v980_v27 }
  0x3a   :  { %910 = vmatmul.mubr.msk.bf16.gmra.mrb[24].mxu0 %vm262_vm0, %v981_v28  ;;  %942 = vmatmul.mubr.msk.bf16.gmra.mrb[24].mxu1 %vm262_vm0, %v982_v29 }
  0x3b   :  { %913 = vmatprep.mubr.msk.bf16.mxu0 %vm262_vm0, %v983_v30  ;;  %945 = vmatprep.mubr.msk.bf16.mxu1 %vm262_vm0, %v984_v31 }
  0x42   :  { %914 = vmatmul.mubr.msk.bf16.gmra.mrb[28].mxu0 %vm262_vm0, %v985_v32  ;;  %946 = vmatmul.mubr.msk.bf16.gmra.mrb[28].mxu1 %vm262_vm0, %v986_v33 }
  0xdd   :  { %v887_v35 = vpop.f32.mrb[0].mxu0  ;;  %v919_v36 = vpop.f32.mrb[0].mxu1 }
  0xde   :  { %v402_v37 = vadd.f32 %v887_v35, %v1144_v34  ;;  %v530_v38 = vadd.f32 %v919_v36, %v1144_v34  ;;  %v393_v39 = vpop.f32.mrb[1].mxu0  ;;  %v521_v40 = vpop.f32.mrb[1].mxu1 }
  0xdf   :  { %v394_v41 = vadd.f32 %v1144_v34, %v393_v39  ;;  %v522_v42 = vadd.f32 %v1144_v34, %v521_v40  ;;  %v888_v43 = vpop.f32.mrb[2].mxu0  ;;  %v920_v44 = vpop.f32.mrb[2].mxu1 }
  0xe0   :  { %v650_v45 = vmax.f32 %v402_v37, 0.0  ;;  %v682_v46 = vmax.f32 %v530_v38, 0.0  ;;  %v405_v47 = vadd.f32 %v888_v43, %v1144_v34  ;;  %v533_v48 = vadd.f32 %v920_v44, %v1144_v34  ;;  %v396_v49 = vpop.f32.mrb[3].mxu0  ;;  %v524_v50 = vpop.f32.mrb[3].mxu1 }
  0xe1   :  { %v648_v51 = vmax.f32 %v394_v41, 0.0  ;;  %v680_v52 = vmax.f32 %v522_v42, 0.0  ;;  %v397_v53 = vadd.f32 %v1144_v34, %v396_v49  ;;  %v525_v54 = vadd.f32 %v1144_v34, %v524_v50 }
  0xe2   :  { %714 = vst [vmem:[%s1405_s3 + $0x10] sm:$0xff] %v650_v45  ;;  %746 = vst [vmem:[%s1405_s3 + $0x110] sm:$0xff] %v682_v46  ;;  %v651_v55 = vmax.f32 %v405_v47, 0.0  ;;  %v683_v56 = vmax.f32 %v533_v48, 0.0 }
  0xe3   :  { %712 = vst [vmem:[%s1405_s3] sm:$0xff] %v648_v51  ;;  %744 = vst [vmem:[%s1405_s3 + $0x100] sm:$0xff] %v680_v52  ;;  %v649_v57 = vmax.f32 %v397_v53, 0.0  ;;  %v681_v58 = vmax.f32 %v525_v54, 0.0 }
  0xe4   :  { %715 = vst [vmem:[%s1405_s3 + $0x18] sm:$0xff] %v651_v55  ;;  %747 = vst [vmem:[%s1405_s3 + $0x118] sm:$0xff] %v683_v56 }
  0xe5   :  { %713 = vst [vmem:[%s1405_s3 + $0x8] sm:$0xff] %v649_v57  ;;  %745 = vst [vmem:[%s1405_s3 + $0x108] sm:$0xff] %v681_v58  ;;  %v891_v59 = vpop.f32.mrb[4].mxu0  ;;  %v923_v60 = vpop.f32.mrb[4].mxu1 }
  0xe6   :  { %v418_v61 = vadd.f32 %v891_v59, %v1144_v34  ;;  %v546_v62 = vadd.f32 %v923_v60, %v1144_v34  ;;  %v409_v63 = vpop.f32.mrb[5].mxu0  ;;  %v537_v0 = vpop.f32.mrb[5].mxu1 }
  0xe7   :  { %v410_v1 = vadd.f32 %v1144_v34, %v409_v63  ;;  %v538_v2 = vadd.f32 %v1144_v34, %v537_v0  ;;  %v892_v3 = vpop.f32.mrb[6].mxu0  ;;  %v924_v4 = vpop.f32.mrb[6].mxu1 }
  0xe8   :  { %v654_v5 = vmax.f32 %v418_v61, 0.0  ;;  %v686_v6 = vmax.f32 %v546_v62, 0.0  ;;  %v421_v7 = vadd.f32 %v892_v3, %v1144_v34  ;;  %v549_v8 = vadd.f32 %v924_v4, %v1144_v34  ;;  %v412_v9 = vpop.f32.mrb[7].mxu0  ;;  %v540_v10 = vpop.f32.mrb[7].mxu1 }
  0xe9   :  { %v652_v11 = vmax.f32 %v410_v1, 0.0  ;;  %v684_v12 = vmax.f32 %v538_v2, 0.0  ;;  %v413_v13 = vadd.f32 %v1144_v34, %v412_v9  ;;  %v541_v14 = vadd.f32 %v1144_v34, %v540_v10 }
  0xea   :  { %718 = vst [vmem:[%s1405_s3 + $0x30] sm:$0xff] %v654_v5  ;;  %750 = vst [vmem:[%s1405_s3 + $0x130] sm:$0xff] %v686_v6  ;;  %v655_v15 = vmax.f32 %v421_v7, 0.0  ;;  %v687_v16 = vmax.f32 %v549_v8, 0.0 }
  0xeb   :  { %716 = vst [vmem:[%s1405_s3 + $0x20] sm:$0xff] %v652_v11  ;;  %748 = vst [vmem:[%s1405_s3 + $0x120] sm:$0xff] %v684_v12  ;;  %v653_v17 = vmax.f32 %v413_v13, 0.0  ;;  %v685_v18 = vmax.f32 %v541_v14, 0.0 }
  0xec   :  { %719 = vst [vmem:[%s1405_s3 + $0x38] sm:$0xff] %v655_v15  ;;  %751 = vst [vmem:[%s1405_s3 + $0x138] sm:$0xff] %v687_v16 }
  0xed   :  { %717 = vst [vmem:[%s1405_s3 + $0x28] sm:$0xff] %v653_v17  ;;  %749 = vst [vmem:[%s1405_s3 + $0x128] sm:$0xff] %v685_v18  ;;  %v895_v19 = vpop.f32.mrb[8].mxu0  ;;  %v927_v20 = vpop.f32.mrb[8].mxu1 }
  0xee   :  { %v434_v21 = vadd.f32 %v895_v19, %v1144_v34  ;;  %v562_v22 = vadd.f32 %v927_v20, %v1144_v34  ;;  %v425_v23 = vpop.f32.mrb[9].mxu0  ;;  %v553_v24 = vpop.f32.mrb[9].mxu1 }
  0xef   :  { %v426_v25 = vadd.f32 %v1144_v34, %v425_v23  ;;  %v554_v26 = vadd.f32 %v1144_v34, %v553_v24  ;;  %v896_v27 = vpop.f32.mrb[10].mxu0  ;;  %v928_v28 = vpop.f32.mrb[10].mxu1 }
  0xf0   :  { %v658_v29 = vmax.f32 %v434_v21, 0.0  ;;  %v690_v30 = vmax.f32 %v562_v22, 0.0  ;;  %v437_v31 = vadd.f32 %v896_v27, %v1144_v34  ;;  %v565_v32 = vadd.f32 %v928_v28, %v1144_v34  ;;  %v428_v33 = vpop.f32.mrb[11].mxu0  ;;  %v556_v35 = vpop.f32.mrb[11].mxu1 }
  0xf1   :  { %v656_v36 = vmax.f32 %v426_v25, 0.0  ;;  %v688_v37 = vmax.f32 %v554_v26, 0.0  ;;  %v429_v38 = vadd.f32 %v1144_v34, %v428_v33  ;;  %v557_v39 = vadd.f32 %v1144_v34, %v556_v35 }
  0xf2   :  { %722 = vst [vmem:[%s1405_s3 + $0x50] sm:$0xff] %v658_v29  ;;  %754 = vst [vmem:[%s1405_s3 + $0x150] sm:$0xff] %v690_v30  ;;  %v659_v40 = vmax.f32 %v437_v31, 0.0  ;;  %v691_v41 = vmax.f32 %v565_v32, 0.0 }
  0xf3   :  { %720 = vst [vmem:[%s1405_s3 + $0x40] sm:$0xff] %v656_v36  ;;  %752 = vst [vmem:[%s1405_s3 + $0x140] sm:$0xff] %v688_v37  ;;  %v657_v42 = vmax.f32 %v429_v38, 0.0  ;;  %v689_v43 = vmax.f32 %v557_v39, 0.0 }
  0xf4   :  { %723 = vst [vmem:[%s1405_s3 + $0x58] sm:$0xff] %v659_v40  ;;  %755 = vst [vmem:[%s1405_s3 + $0x158] sm:$0xff] %v691_v41 }
  0xf5   :  { %721 = vst [vmem:[%s1405_s3 + $0x48] sm:$0xff] %v657_v42  ;;  %753 = vst [vmem:[%s1405_s3 + $0x148] sm:$0xff] %v689_v43  ;;  %v899_v44 = vpop.f32.mrb[12].mxu0  ;;  %v931_v45 = vpop.f32.mrb[12].mxu1 }
  0xf6   :  { %v450_v46 = vadd.f32 %v899_v44, %v1144_v34  ;;  %v578_v47 = vadd.f32 %v931_v45, %v1144_v34  ;;  %v441_v48 = vpop.f32.mrb[13].mxu0  ;;  %v569_v49 = vpop.f32.mrb[13].mxu1 }
  0xf7   :  { %v442_v50 = vadd.f32 %v1144_v34, %v441_v48  ;;  %v570_v51 = vadd.f32 %v1144_v34, %v569_v49  ;;  %v900_v52 = vpop.f32.mrb[14].mxu0  ;;  %v932_v53 = vpop.f32.mrb[14].mxu1 }
  0xf8   :  { %v662_v54 = vmax.f32 %v450_v46, 0.0  ;;  %v694_v55 = vmax.f32 %v578_v47, 0.0  ;;  %v453_v56 = vadd.f32 %v900_v52, %v1144_v34  ;;  %v581_v57 = vadd.f32 %v932_v53, %v1144_v34  ;;  %v444_v58 = vpop.f32.mrb[15].mxu0  ;;  %v572_v59 = vpop.f32.mrb[15].mxu1 }
  0xf9   :  { %v660_v60 = vmax.f32 %v442_v50, 0.0  ;;  %v692_v61 = vmax.f32 %v570_v51, 0.0  ;;  %v445_v62 = vadd.f32 %v1144_v34, %v444_v58  ;;  %v573_v63 = vadd.f32 %v1144_v34, %v572_v59 }
  0xfa   :  { %726 = vst [vmem:[%s1405_s3 + $0x70] sm:$0xff] %v662_v54  ;;  %758 = vst [vmem:[%s1405_s3 + $0x170] sm:$0xff] %v694_v55  ;;  %v663_v0 = vmax.f32 %v453_v56, 0.0  ;;  %v695_v1 = vmax.f32 %v581_v57, 0.0 }
  0xfb   :  { %724 = vst [vmem:[%s1405_s3 + $0x60] sm:$0xff] %v660_v60  ;;  %756 = vst [vmem:[%s1405_s3 + $0x160] sm:$0xff] %v692_v61  ;;  %v661_v2 = vmax.f32 %v445_v62, 0.0  ;;  %v693_v3 = vmax.f32 %v573_v63, 0.0 }
  0xfc   :  { %727 = vst [vmem:[%s1405_s3 + $0x78] sm:$0xff] %v663_v0  ;;  %759 = vst [vmem:[%s1405_s3 + $0x178] sm:$0xff] %v695_v1 }
  0xfd   :  { %725 = vst [vmem:[%s1405_s3 + $0x68] sm:$0xff] %v661_v2  ;;  %757 = vst [vmem:[%s1405_s3 + $0x168] sm:$0xff] %v693_v3  ;;  %v903_v4 = vpop.f32.mrb[16].mxu0  ;;  %v935_v5 = vpop.f32.mrb[16].mxu1 }
  0xfe   :  { %v466_v6 = vadd.f32 %v903_v4, %v1144_v34  ;;  %v594_v7 = vadd.f32 %v935_v5, %v1144_v34  ;;  %v457_v8 = vpop.f32.mrb[17].mxu0  ;;  %v585_v9 = vpop.f32.mrb[17].mxu1 }
  0xff   :  { %v458_v10 = vadd.f32 %v1144_v34, %v457_v8  ;;  %v586_v11 = vadd.f32 %v1144_v34, %v585_v9  ;;  %v904_v12 = vpop.f32.mrb[18].mxu0  ;;  %v936_v13 = vpop.f32.mrb[18].mxu1 }
 0x100   :  { %v666_v14 = vmax.f32 %v466_v6, 0.0  ;;  %v698_v15 = vmax.f32 %v594_v7, 0.0  ;;  %v469_v16 = vadd.f32 %v904_v12, %v1144_v34  ;;  %v597_v17 = vadd.f32 %v936_v13, %v1144_v34  ;;  %v460_v18 = vpop.f32.mrb[19].mxu0  ;;  %v588_v19 = vpop.f32.mrb[19].mxu1 }
 0x101   :  { %v664_v20 = vmax.f32 %v458_v10, 0.0  ;;  %v696_v21 = vmax.f32 %v586_v11, 0.0  ;;  %v461_v22 = vadd.f32 %v1144_v34, %v460_v18  ;;  %v589_v23 = vadd.f32 %v1144_v34, %v588_v19 }
 0x102   :  { %730 = vst [vmem:[%s1405_s3 + $0x90] sm:$0xff] %v666_v14  ;;  %762 = vst [vmem:[%s1405_s3 + $0x190] sm:$0xff] %v698_v15  ;;  %v667_v24 = vmax.f32 %v469_v16, 0.0  ;;  %v699_v25 = vmax.f32 %v597_v17, 0.0 }
 0x103   :  { %728 = vst [vmem:[%s1405_s3 + $0x80] sm:$0xff] %v664_v20  ;;  %760 = vst [vmem:[%s1405_s3 + $0x180] sm:$0xff] %v696_v21  ;;  %v665_v26 = vmax.f32 %v461_v22, 0.0  ;;  %v697_v27 = vmax.f32 %v589_v23, 0.0 }
 0x104   :  { %731 = vst [vmem:[%s1405_s3 + $0x98] sm:$0xff] %v667_v24  ;;  %763 = vst [vmem:[%s1405_s3 + $0x198] sm:$0xff] %v699_v25 }
 0x105   :  { %729 = vst [vmem:[%s1405_s3 + $0x88] sm:$0xff] %v665_v26  ;;  %761 = vst [vmem:[%s1405_s3 + $0x188] sm:$0xff] %v697_v27  ;;  %v907_v28 = vpop.f32.mrb[20].mxu0  ;;  %v939_v29 = vpop.f32.mrb[20].mxu1 }
 0x106   :  { %v482_v30 = vadd.f32 %v907_v28, %v1144_v34  ;;  %v610_v31 = vadd.f32 %v939_v29, %v1144_v34  ;;  %v473_v32 = vpop.f32.mrb[21].mxu0  ;;  %v601_v33 = vpop.f32.mrb[21].mxu1 }
 0x107   :  { %v474_v35 = vadd.f32 %v1144_v34, %v473_v32  ;;  %v602_v36 = vadd.f32 %v1144_v34, %v601_v33  ;;  %v908_v37 = vpop.f32.mrb[22].mxu0  ;;  %v940_v38 = vpop.f32.mrb[22].mxu1 }
 0x108   :  { %v670_v39 = vmax.f32 %v482_v30, 0.0  ;;  %v702_v40 = vmax.f32 %v610_v31, 0.0  ;;  %v485_v41 = vadd.f32 %v908_v37, %v1144_v34  ;;  %v613_v42 = vadd.f32 %v940_v38, %v1144_v34  ;;  %v476_v43 = vpop.f32.mrb[23].mxu0  ;;  %v604_v44 = vpop.f32.mrb[23].mxu1 }
 0x109   :  { %v668_v45 = vmax.f32 %v474_v35, 0.0  ;;  %v700_v46 = vmax.f32 %v602_v36, 0.0  ;;  %v477_v47 = vadd.f32 %v1144_v34, %v476_v43  ;;  %v605_v48 = vadd.f32 %v1144_v34, %v604_v44 }
 0x10a   :  { %734 = vst [vmem:[%s1405_s3 + $0xb0] sm:$0xff] %v670_v39  ;;  %766 = vst [vmem:[%s1405_s3 + $0x1b0] sm:$0xff] %v702_v40  ;;  %v671_v49 = vmax.f32 %v485_v41, 0.0  ;;  %v703_v50 = vmax.f32 %v613_v42, 0.0 }
 0x10b   :  { %732 = vst [vmem:[%s1405_s3 + $0xa0] sm:$0xff] %v668_v45  ;;  %764 = vst [vmem:[%s1405_s3 + $0x1a0] sm:$0xff] %v700_v46  ;;  %v669_v51 = vmax.f32 %v477_v47, 0.0  ;;  %v701_v52 = vmax.f32 %v605_v48, 0.0 }
 0x10c   :  { %735 = vst [vmem:[%s1405_s3 + $0xb8] sm:$0xff] %v671_v49  ;;  %767 = vst [vmem:[%s1405_s3 + $0x1b8] sm:$0xff] %v703_v50 }
 0x10d   :  { %733 = vst [vmem:[%s1405_s3 + $0xa8] sm:$0xff] %v669_v51  ;;  %765 = vst [vmem:[%s1405_s3 + $0x1a8] sm:$0xff] %v701_v52  ;;  %v911_v53 = vpop.f32.mrb[24].mxu0  ;;  %v943_v54 = vpop.f32.mrb[24].mxu1 }
 0x10e   :  { %v498_v55 = vadd.f32 %v911_v53, %v1144_v34  ;;  %v626_v56 = vadd.f32 %v943_v54, %v1144_v34  ;;  %v489_v57 = vpop.f32.mrb[25].mxu0  ;;  %v617_v58 = vpop.f32.mrb[25].mxu1 }
 0x10f   :  { %v490_v59 = vadd.f32 %v1144_v34, %v489_v57  ;;  %v618_v60 = vadd.f32 %v1144_v34, %v617_v58  ;;  %v912_v61 = vpop.f32.mrb[26].mxu0  ;;  %v944_v62 = vpop.f32.mrb[26].mxu1 }
 0x110   :  { %v674_v63 = vmax.f32 %v498_v55, 0.0  ;;  %v706_v0 = vmax.f32 %v626_v56, 0.0  ;;  %v501_v1 = vadd.f32 %v912_v61, %v1144_v34  ;;  %v629_v2 = vadd.f32 %v944_v62, %v1144_v34  ;;  %v492_v3 = vpop.f32.mrb[27].mxu0  ;;  %v620_v4 = vpop.f32.mrb[27].mxu1 }
 0x111   :  { %v672_v5 = vmax.f32 %v490_v59, 0.0  ;;  %v704_v6 = vmax.f32 %v618_v60, 0.0  ;;  %v493_v7 = vadd.f32 %v1144_v34, %v492_v3  ;;  %v621_v8 = vadd.f32 %v1144_v34, %v620_v4 }
 0x112   :  { %738 = vst [vmem:[%s1405_s3 + $0xd0] sm:$0xff] %v674_v63  ;;  %770 = vst [vmem:[%s1405_s3 + $0x1d0] sm:$0xff] %v706_v0  ;;  %v675_v9 = vmax.f32 %v501_v1, 0.0  ;;  %v707_v10 = vmax.f32 %v629_v2, 0.0 }
 0x113   :  { %736 = vst [vmem:[%s1405_s3 + $0xc0] sm:$0xff] %v672_v5  ;;  %768 = vst [vmem:[%s1405_s3 + $0x1c0] sm:$0xff] %v704_v6  ;;  %v673_v11 = vmax.f32 %v493_v7, 0.0  ;;  %v705_v12 = vmax.f32 %v621_v8, 0.0 }
 0x114   :  { %739 = vst [vmem:[%s1405_s3 + $0xd8] sm:$0xff] %v675_v9  ;;  %771 = vst [vmem:[%s1405_s3 + $0x1d8] sm:$0xff] %v707_v10 }
 0x115   :  { %737 = vst [vmem:[%s1405_s3 + $0xc8] sm:$0xff] %v673_v11  ;;  %769 = vst [vmem:[%s1405_s3 + $0x1c8] sm:$0xff] %v705_v12  ;;  %v915_v13 = vpop.f32.mrb[28].mxu0  ;;  %v947_v14 = vpop.f32.mrb[28].mxu1 }
 0x116   :  { %v514_v15 = vadd.f32 %v915_v13, %v1144_v34  ;;  %v642_v16 = vadd.f32 %v947_v14, %v1144_v34  ;;  %v505_v17 = vpop.f32.mrb[29].mxu0  ;;  %v633_v18 = vpop.f32.mrb[29].mxu1 }
 0x117   :  { %v506_v19 = vadd.f32 %v1144_v34, %v505_v17  ;;  %v634_v20 = vadd.f32 %v1144_v34, %v633_v18  ;;  %v916_v21 = vpop.f32.mrb[30].mxu0  ;;  %v948_v22 = vpop.f32.mrb[30].mxu1 }
 0x118   :  { %v678_v23 = vmax.f32 %v514_v15, 0.0  ;;  %v710_v24 = vmax.f32 %v642_v16, 0.0  ;;  %v517_v25 = vadd.f32 %v916_v21, %v1144_v34  ;;  %v645_v26 = vadd.f32 %v948_v22, %v1144_v34  ;;  %v508_v27 = vpop.f32.mrb[31].mxu0  ;;  %v636_v28 = vpop.f32.mrb[31].mxu1 }
 0x119   :  { %v676_v29 = vmax.f32 %v506_v19, 0.0  ;;  %v708_v30 = vmax.f32 %v634_v20, 0.0  ;;  %v509_v31 = vadd.f32 %v1144_v34, %v508_v27  ;;  %v637_v32 = vadd.f32 %v1144_v34, %v636_v28 }
 0x11a   :  { %742 = vst [vmem:[%s1405_s3 + $0xf0] sm:$0xff] %v678_v23  ;;  %774 = vst [vmem:[%s1405_s3 + $0x1f0] sm:$0xff] %v710_v24  ;;  %v679_v33 = vmax.f32 %v517_v25, 0.0  ;;  %v711_v35 = vmax.f32 %v645_v26, 0.0 }
 0x11b   :  { %740 = vst [vmem:[%s1405_s3 + $0xe0] sm:$0xff] %v676_v29  ;;  %772 = vst [vmem:[%s1405_s3 + $0x1e0] sm:$0xff] %v708_v30  ;;  %v677_v36 = vmax.f32 %v509_v31, 0.0  ;;  %v709_v34 = vmax.f32 %v637_v32, 0.0 }
 0x11c   :  { %743 = vst [vmem:[%s1405_s3 + $0xf8] sm:$0xff] %v679_v33  ;;  %775 = vst [vmem:[%s1405_s3 + $0x1f8] sm:$0xff] %v711_v35 }
 0x11d   :  { %741 = vst [vmem:[%s1405_s3 + $0xe8] sm:$0xff] %v677_v36  ;;  %773 = vst [vmem:[%s1405_s3 + $0x1e8] sm:$0xff] %v709_v34 }

// kernel: cotraining_forward.14
= control target key start
LH: loop header
LB: loop body
LE: loop exit
PB: predicated region body
PF: predicated region fallthrough
CT: control target
= control target key end

     0   :  { %v426_v0 = vmov 0   ;;  %vm182_vm0 = vcmask 130048   ;;  %s599_s1 = inlined_call_operand.vmem [shape: bf16[144,128], index: 1, kind: input, shape index: {}]   ;;  %s600_s0 = inlined_call_operand.vmem [shape: bf16[128,144], index: 0, kind: input, shape index: {}]   ;;  %s601_s2 = inlined_call_operand.vmem [shape: f32[1,128], index: 2, kind: input, shape index: {}]   ;;  %s602_s3 = inlined_call_operand.vmem [shape: f32[128,128], index: 3, kind: output, shape index: {}]  }
   0x1   :  { %207 = vmatprep.subr.bf16.mxu0 %v426_v0  ;;  %374 = vmatprep.subr.bf16.mxu1 %v426_v0  ;;  %v393_v1 = vld [vmem:[%s599_s1] sm:$0xff]   ;;  %v394_v2 = vld [vmem:[%s599_s1 + $0x8] sm:$0xff]   ;;  %v395_v3 = vld [vmem:[%s599_s1 + $0x10] sm:$0xff]  }
   0x2   :  { %208 = vmatpush1.bf16.msra.mxu0 %v393_v1  ;;  %383 = vmatpush1.bf16.msra.mxu1 %v393_v1  ;;  %v396_v4 = vld [vmem:[%s599_s1 + $0x18] sm:$0xff]   ;;  %v404_v5 = vld [vmem:[%s600_s0 + $0x4] ss:$8 sps:$4 sm:$0xff]   ;;  %v399_v9 = vld [vmem:[%s599_s1 + $0x30] sm:$0xff]  }
   0x3   :  { %209 = vmatprep.subr.bf16.mxu0 %v426_v0  ;;  %375 = vmatprep.subr.bf16.mxu1 %v426_v0  ;;  %v407_v6 = vld [vmem:[%s600_s0 + $0x44] ss:$8 sps:$4 sm:$0xff]   ;;  %v400_v10 = vld [vmem:[%s599_s1 + $0x38] sm:$0xff]   ;;  %v402_v12 = vld [vmem:[%s600_s0] ss:$8 sps:$4 sm:$0xff]  }
   0x4   :  { %366 = vmatprep.mubr.msk.bf16.mxu0 %vm182_vm0, %v404_v5  ;;  %370 = vmatprep.mubr.msk.bf16.mxu1 %vm182_vm0, %v407_v6  ;;  %v397_v7 = vld [vmem:[%s599_s1 + $0x20] sm:$0xff]   ;;  %v398_v8 = vld [vmem:[%s599_s1 + $0x28] sm:$0xff]   ;;  %v408_v14 = vld [vmem:[%s600_s0 + $0x14] ss:$8 sps:$4 sm:$0xff]  }
   0x5   :  { %v401_v11 = vld [vmem:[%s599_s1 + $0x40] sm:$0xff]   ;;  %v410_v15 = vld [vmem:[%s600_s0 + $0x54] ss:$8 sps:$4 sm:$0xff]   ;;  %v412_v16 = vld [vmem:[%s600_s0 + $0x10] ss:$8 sps:$4 sm:$0xff]  }
   0x6   :  { %210 = vmatpush1.bf16.msra.mxu0 %v394_v2  ;;  %384 = vmatpush1.bf16.msra.mxu1 %v394_v2  ;;  %v405_v13 = vld [vmem:[%s600_s0 + $0x40] ss:$8 sps:$4 sm:$0xff]   ;;  %v413_v17 = vld [vmem:[%s600_s0 + $0x50] ss:$8 sps:$4 sm:$0xff]   ;;  %v414_v18 = vld [vmem:[%s600_s0 + $0x24] ss:$8 sps:$4 sm:$0xff]  }
   0x7   :  { %211 = vmatprep.subr.bf16.mxu0 %v426_v0  ;;  %376 = vmatprep.subr.bf16.mxu1 %v426_v0  ;;  %v416_v19 = vld [vmem:[%s600_s0 + $0x64] ss:$8 sps:$4 sm:$0xff]   ;;  %v418_v20 = vld [vmem:[%s600_s0 + $0x20] ss:$8 sps:$4 sm:$0xff]   ;;  %v420_v22 = vld [vmem:[%s600_s0 + $0x34] ss:$8 sps:$4 sm:$0xff]  }
   0x8   :  { %v419_v21 = vld [vmem:[%s600_s0 + $0x60] ss:$8 sps:$4 sm:$0xff]   ;;  %v422_v23 = vld [vmem:[%s600_s0 + $0x74] ss:$8 sps:$4 sm:$0xff]   ;;  %v424_v24 = vld [vmem:[%s600_s0 + $0x30] ss:$8 sps:$4 sm:$0xff]  }
   0x9   :  { %v425_v25 = vld [vmem:[%s600_s0 + $0x70] ss:$8 sps:$4 sm:$0xff]   ;;  %v533_v26 = vld [vmem:[%s601_s2] ss:$0 sm:$0xff] }
   0xa   :  { %212 = vmatpush1.bf16.msra.mxu0 %v395_v3  ;;  %385 = vmatpush1.bf16.msra.mxu1 %v395_v3 }
   0xb   :  { %213 = vmatprep.subr.bf16.mxu0 %v426_v0  ;;  %377 = vmatprep.subr.bf16.mxu1 %v426_v0 }
   0xe   :  { %214 = vmatpush1.bf16.msra.mxu0 %v396_v4  ;;  %386 = vmatpush1.bf16.msra.mxu1 %v396_v4 }
   0xf   :  { %215 = vmatprep.subr.bf16.mxu0 %v426_v0  ;;  %378 = vmatprep.subr.bf16.mxu1 %v426_v0 }
  0x12   :  { %216 = vmatpush1.bf16.msra.mxu0 %v397_v7  ;;  %387 = vmatpush1.bf16.msra.mxu1 %v397_v7 }
  0x13   :  { %217 = vmatprep.subr.bf16.mxu0 %v426_v0  ;;  %379 = vmatprep.subr.bf16.mxu1 %v426_v0 }
  0x16   :  { %218 = vmatpush1.bf16.msra.mxu0 %v398_v8  ;;  %388 = vmatpush1.bf16.msra.mxu1 %v398_v8 }
  0x17   :  { %219 = vmatprep.subr.bf16.mxu0 %v426_v0  ;;  %380 = vmatprep.subr.bf16.mxu1 %v426_v0 }
  0x1a   :  { %220 = vmatpush1.bf16.msra.mxu0 %v399_v9  ;;  %389 = vmatpush1.bf16.msra.mxu1 %v399_v9 }
  0x1b   :  { %221 = vmatprep.subr.bf16.mxu0 %v426_v0  ;;  %381 = vmatprep.subr.bf16.mxu1 %v426_v0 }
  0x1e   :  { %222 = vmatpush1.bf16.msra.mxu0 %v400_v10  ;;  %390 = vmatpush1.bf16.msra.mxu1 %v400_v10 }
  0x1f   :  { %223 = vmatprep.subr.bf16.mxu0 %v426_v0  ;;  %382 = vmatprep.subr.bf16.mxu1 %v426_v0 }
  0x22   :  { %224 = vmatpush1.bf16.msra.mxu0 %v401_v11  ;;  %391 = vmatpush1.bf16.msra.mxu1 %v401_v11 }
  0x25   :  { %240 = vmatmul.mubr.bf16.vlgmr.msra.gmra.mrb[0].mxu0 %v402_v12  ;;  %272 = vmatmul.mubr.bf16.vlgmr.msra.gmra.mrb[0].mxu1 %v405_v13 }
  0x26   :  { %367 = vmatprep.mubr.msk.bf16.mxu0 %vm182_vm0, %v408_v14  ;;  %371 = vmatprep.mubr.msk.bf16.mxu1 %vm182_vm0, %v410_v15 }
  0x2d   :  { %248 = vmatmul.mubr.bf16.gmra.mrb[4].mxu0 %v412_v16  ;;  %280 = vmatmul.mubr.bf16.gmra.mrb[4].mxu1 %v413_v17 }
  0x2e   :  { %368 = vmatprep.mubr.msk.bf16.mxu0 %vm182_vm0, %v414_v18  ;;  %372 = vmatprep.mubr.msk.bf16.mxu1 %vm182_vm0, %v416_v19 }
  0x35   :  { %256 = vmatmul.mubr.bf16.gmra.mrb[8].mxu0 %v418_v20  ;;  %288 = vmatmul.mubr.bf16.gmra.mrb[8].mxu1 %v419_v21 }
  0x36   :  { %369 = vmatprep.mubr.msk.bf16.mxu0 %vm182_vm0, %v420_v22  ;;  %373 = vmatprep.mubr.msk.bf16.mxu1 %vm182_vm0, %v422_v23 }
  0x3d   :  { %264 = vmatmul.mubr.bf16.gmra.mrb[12].mxu0 %v424_v24  ;;  %296 = vmatmul.mubr.bf16.gmra.mrb[12].mxu1 %v425_v25 }
  0xf8   :  { %v241_v27 = vpop.f32.mrb[0].mxu0  ;;  %v273_v28 = vpop.f32.mrb[0].mxu1 }
  0xf9   :  { %v242_v29 = vadd.f32 %v533_v26, %v241_v27  ;;  %v274_v30 = vadd.f32 %v533_v26, %v273_v28  ;;  %v243_v31 = vpop.f32.mrb[1].mxu0  ;;  %v275_v32 = vpop.f32.mrb[1].mxu1 }
  0xfa   :  { %v244_v33 = vpop.f32.mrb[2].mxu0  ;;  %v276_v34 = vpop.f32.mrb[2].mxu1 }
  0xfb   :  { %v304_v35 = vmax.f32 %v242_v29, 0.0  ;;  %v312_v36 = vmax.f32 %v274_v30, 0.0  ;;  %v245_v37 = vadd.f32 %v533_v26, %v244_v33  ;;  %v277_v38 = vadd.f32 %v533_v26, %v276_v34  ;;  %v246_v39 = vpop.f32.mrb[3].mxu0  ;;  %v278_v40 = vpop.f32.mrb[3].mxu1 }
  0xfd   :  { %320 = vst [vmem:[%s602_s3] sm:$0xff] %v304_v35  ;;  %328 = vst [vmem:[%s602_s3 + $0x40] sm:$0xff] %v312_v36  ;;  %v305_v41 = vmax.f32 %v245_v37, 0.0  ;;  %v313_v42 = vmax.f32 %v277_v38, 0.0 }
  0xff   :  { %321 = vst [vmem:[%s602_s3 + $0x8] sm:$0xff] %v305_v41  ;;  %329 = vst [vmem:[%s602_s3 + $0x48] sm:$0xff] %v313_v42 }
 0x100   :  { %v249_v43 = vpop.f32.mrb[4].mxu0  ;;  %v281_v44 = vpop.f32.mrb[4].mxu1 }
 0x101   :  { %v250_v45 = vadd.f32 %v533_v26, %v249_v43  ;;  %v282_v46 = vadd.f32 %v533_v26, %v281_v44  ;;  %v251_v47 = vpop.f32.mrb[5].mxu0  ;;  %v283_v48 = vpop.f32.mrb[5].mxu1 }
 0x102   :  { %v252_v49 = vpop.f32.mrb[6].mxu0  ;;  %v284_v50 = vpop.f32.mrb[6].mxu1 }
 0x103   :  { %v306_v51 = vmax.f32 %v250_v45, 0.0  ;;  %v314_v52 = vmax.f32 %v282_v46, 0.0  ;;  %v253_v53 = vadd.f32 %v533_v26, %v252_v49  ;;  %v285_v54 = vadd.f32 %v533_v26, %v284_v50  ;;  %v254_v55 = vpop.f32.mrb[7].mxu0  ;;  %v286_v56 = vpop.f32.mrb[7].mxu1 }
 0x105   :  { %322 = vst [vmem:[%s602_s3 + $0x10] sm:$0xff] %v306_v51  ;;  %330 = vst [vmem:[%s602_s3 + $0x50] sm:$0xff] %v314_v52  ;;  %v307_v57 = vmax.f32 %v253_v53, 0.0  ;;  %v315_v58 = vmax.f32 %v285_v54, 0.0 }
 0x107   :  { %323 = vst [vmem:[%s602_s3 + $0x18] sm:$0xff] %v307_v57  ;;  %331 = vst [vmem:[%s602_s3 + $0x58] sm:$0xff] %v315_v58 }
 0x108   :  { %v257_v59 = vpop.f32.mrb[8].mxu0  ;;  %v289_v60 = vpop.f32.mrb[8].mxu1 }
 0x109   :  { %v258_v61 = vadd.f32 %v533_v26, %v257_v59  ;;  %v290_v62 = vadd.f32 %v533_v26, %v289_v60  ;;  %v259_v63 = vpop.f32.mrb[9].mxu0  ;;  %v291_v0 = vpop.f32.mrb[9].mxu1 }
 0x10a   :  { %v260_v1 = vpop.f32.mrb[10].mxu0  ;;  %v292_v2 = vpop.f32.mrb[10].mxu1 }
 0x10b   :  { %v308_v3 = vmax.f32 %v258_v61, 0.0  ;;  %v316_v4 = vmax.f32 %v290_v62, 0.0  ;;  %v261_v5 = vadd.f32 %v533_v26, %v260_v1  ;;  %v293_v6 = vadd.f32 %v533_v26, %v292_v2  ;;  %v262_v7 = vpop.f32.mrb[11].mxu0  ;;  %v294_v8 = vpop.f32.mrb[11].mxu1 }
 0x10d   :  { %324 = vst [vmem:[%s602_s3 + $0x20] sm:$0xff] %v308_v3  ;;  %332 = vst [vmem:[%s602_s3 + $0x60] sm:$0xff] %v316_v4  ;;  %v309_v9 = vmax.f32 %v261_v5, 0.0  ;;  %v317_v10 = vmax.f32 %v293_v6, 0.0 }
 0x10f   :  { %325 = vst [vmem:[%s602_s3 + $0x28] sm:$0xff] %v309_v9  ;;  %333 = vst [vmem:[%s602_s3 + $0x68] sm:$0xff] %v317_v10 }
 0x110   :  { %v265_v11 = vpop.f32.mrb[12].mxu0  ;;  %v297_v12 = vpop.f32.mrb[12].mxu1 }
 0x111   :  { %v266_v13 = vadd.f32 %v533_v26, %v265_v11  ;;  %v298_v14 = vadd.f32 %v533_v26, %v297_v12  ;;  %v267_v15 = vpop.f32.mrb[13].mxu0  ;;  %v299_v16 = vpop.f32.mrb[13].mxu1 }
 0x112   :  { %v268_v17 = vpop.f32.mrb[14].mxu0  ;;  %v300_v18 = vpop.f32.mrb[14].mxu1 }
 0x113   :  { %v310_v19 = vmax.f32 %v266_v13, 0.0  ;;  %v318_v20 = vmax.f32 %v298_v14, 0.0  ;;  %v269_v21 = vadd.f32 %v533_v26, %v268_v17  ;;  %v301_v22 = vadd.f32 %v533_v26, %v300_v18  ;;  %v270_v23 = vpop.f32.mrb[15].mxu0  ;;  %v302_v24 = vpop.f32.mrb[15].mxu1 }
 0x115   :  { %326 = vst [vmem:[%s602_s3 + $0x30] sm:$0xff] %v310_v19  ;;  %334 = vst [vmem:[%s602_s3 + $0x70] sm:$0xff] %v318_v20  ;;  %v311_v25 = vmax.f32 %v269_v21, 0.0  ;;  %v319_v27 = vmax.f32 %v301_v22, 0.0 }
 0x117   :  { %327 = vst [vmem:[%s602_s3 + $0x38] sm:$0xff] %v311_v25  ;;  %335 = vst [vmem:[%s602_s3 + $0x78] sm:$0xff] %v319_v27 }

// kernel: cotraining_forward.15
= control target key start
LH: loop header
LB: loop body
LE: loop exit
PB: predicated region body
PF: predicated region fallthrough
CT: control target
= control target key end

     0   :  { %v461_v0 = vmov 0   ;;  %vm185_vm0 = vcmask 130048   ;;  %s687_s1 = inlined_call_operand.vmem [shape: bf16[144,128], index: 1, kind: input, shape index: {}]   ;;  %s688_s0 = inlined_call_operand.vmem [shape: bf16[128,144], index: 0, kind: input, shape index: {}]   ;;  %s689_s2 = inlined_call_operand.vmem [shape: f32[1,128], index: 2, kind: input, shape index: {}]   ;;  %s690_s3 = inlined_call_operand.vmem [shape: f32[128,128], index: 3, kind: input, shape index: {}]   ;;  %s691_s4 = inlined_call_operand.vmem [shape: f32[128,128], index: 4, kind: output, shape index: {}]  }
   0x1   :  { %210 = vmatprep.subr.bf16.mxu0 %v461_v0  ;;  %409 = vmatprep.subr.bf16.mxu1 %v461_v0  ;;  %v428_v1 = vld [vmem:[%s687_s1] sm:$0xff]   ;;  %v429_v2 = vld [vmem:[%s687_s1 + $0x8] sm:$0xff]   ;;  %v430_v3 = vld [vmem:[%s687_s1 + $0x10] sm:$0xff]  }
   0x2   :  { %211 = vmatpush1.bf16.msra.mxu0 %v428_v1  ;;  %418 = vmatpush1.bf16.msra.mxu1 %v428_v1  ;;  %v431_v4 = vld [vmem:[%s687_s1 + $0x18] sm:$0xff]   ;;  %v439_v5 = vld [vmem:[%s688_s0 + $0x4] ss:$8 sps:$4 sm:$0xff]   ;;  %v434_v9 = vld [vmem:[%s687_s1 + $0x30] sm:$0xff]  }
   0x3   :  { %212 = vmatprep.subr.bf16.mxu0 %v461_v0  ;;  %410 = vmatprep.subr.bf16.mxu1 %v461_v0  ;;  %v442_v6 = vld [vmem:[%s688_s0 + $0x44] ss:$8 sps:$4 sm:$0xff]   ;;  %v435_v10 = vld [vmem:[%s687_s1 + $0x38] sm:$0xff]   ;;  %v437_v12 = vld [vmem:[%s688_s0] ss:$8 sps:$4 sm:$0xff]  }
   0x4   :  { %401 = vmatprep.mubr.msk.bf16.mxu0 %vm185_vm0, %v439_v5  ;;  %405 = vmatprep.mubr.msk.bf16.mxu1 %vm185_vm0, %v442_v6  ;;  %v432_v7 = vld [vmem:[%s687_s1 + $0x20] sm:$0xff]   ;;  %v433_v8 = vld [vmem:[%s687_s1 + $0x28] sm:$0xff]   ;;  %v443_v14 = vld [vmem:[%s688_s0 + $0x14] ss:$8 sps:$4 sm:$0xff]  }
   0x5   :  { %v436_v11 = vld [vmem:[%s687_s1 + $0x40] sm:$0xff]   ;;  %v445_v15 = vld [vmem:[%s688_s0 + $0x54] ss:$8 sps:$4 sm:$0xff]   ;;  %v447_v16 = vld [vmem:[%s688_s0 + $0x10] ss:$8 sps:$4 sm:$0xff]  }
   0x6   :  { %213 = vmatpush1.bf16.msra.mxu0 %v429_v2  ;;  %419 = vmatpush1.bf16.msra.mxu1 %v429_v2  ;;  %v440_v13 = vld [vmem:[%s688_s0 + $0x40] ss:$8 sps:$4 sm:$0xff]   ;;  %v448_v17 = vld [vmem:[%s688_s0 + $0x50] ss:$8 sps:$4 sm:$0xff]   ;;  %v449_v18 = vld [vmem:[%s688_s0 + $0x24] ss:$8 sps:$4 sm:$0xff]  }
   0x7   :  { %214 = vmatprep.subr.bf16.mxu0 %v461_v0  ;;  %411 = vmatprep.subr.bf16.mxu1 %v461_v0  ;;  %v451_v19 = vld [vmem:[%s688_s0 + $0x64] ss:$8 sps:$4 sm:$0xff]   ;;  %v453_v20 = vld [vmem:[%s688_s0 + $0x20] ss:$8 sps:$4 sm:$0xff]   ;;  %v455_v22 = vld [vmem:[%s688_s0 + $0x34] ss:$8 sps:$4 sm:$0xff]  }
   0x8   :  { %v454_v21 = vld [vmem:[%s688_s0 + $0x60] ss:$8 sps:$4 sm:$0xff]   ;;  %v457_v23 = vld [vmem:[%s688_s0 + $0x74] ss:$8 sps:$4 sm:$0xff]   ;;  %v459_v24 = vld [vmem:[%s688_s0 + $0x30] ss:$8 sps:$4 sm:$0xff]  }
   0x9   :  { %v460_v25 = vld [vmem:[%s688_s0 + $0x70] ss:$8 sps:$4 sm:$0xff]   ;;  %v573_v26 = vld [vmem:[%s689_s2] ss:$0 sm:$0xff]  ;;  %v308_v36 = vld [vmem:[%s690_s3 + $0x8] sm:$0xff] }
   0xa   :  { %215 = vmatpush1.bf16.msra.mxu0 %v430_v3  ;;  %420 = vmatpush1.bf16.msra.mxu1 %v430_v3  ;;  %v307_v28 = vld [vmem:[%s690_s3] sm:$0xff]  ;;  %v316_v38 = vld [vmem:[%s690_s3 + $0x48] sm:$0xff]  ;;  %v309_v52 = vld [vmem:[%s690_s3 + $0x10] sm:$0xff] }
   0xb   :  { %216 = vmatprep.subr.bf16.mxu0 %v461_v0  ;;  %412 = vmatprep.subr.bf16.mxu1 %v461_v0  ;;  %v315_v30 = vld [vmem:[%s690_s3 + $0x40] sm:$0xff]  ;;  %v317_v54 = vld [vmem:[%s690_s3 + $0x50] sm:$0xff]  ;;  %v310_v60 = vld [vmem:[%s690_s3 + $0x18] sm:$0xff] }
   0xc   :  { %v318_v62 = vld [vmem:[%s690_s3 + $0x58] sm:$0xff] }
   0xe   :  { %217 = vmatpush1.bf16.msra.mxu0 %v431_v4  ;;  %421 = vmatpush1.bf16.msra.mxu1 %v431_v4 }
   0xf   :  { %218 = vmatprep.subr.bf16.mxu0 %v461_v0  ;;  %413 = vmatprep.subr.bf16.mxu1 %v461_v0 }
  0x12   :  { %219 = vmatpush1.bf16.msra.mxu0 %v432_v7  ;;  %422 = vmatpush1.bf16.msra.mxu1 %v432_v7 }
  0x13   :  { %220 = vmatprep.subr.bf16.mxu0 %v461_v0  ;;  %414 = vmatprep.subr.bf16.mxu1 %v461_v0 }
  0x16   :  { %221 = vmatpush1.bf16.msra.mxu0 %v433_v8  ;;  %423 = vmatpush1.bf16.msra.mxu1 %v433_v8 }
  0x17   :  { %222 = vmatprep.subr.bf16.mxu0 %v461_v0  ;;  %415 = vmatprep.subr.bf16.mxu1 %v461_v0 }
  0x1a   :  { %223 = vmatpush1.bf16.msra.mxu0 %v434_v9  ;;  %424 = vmatpush1.bf16.msra.mxu1 %v434_v9 }
  0x1b   :  { %224 = vmatprep.subr.bf16.mxu0 %v461_v0  ;;  %416 = vmatprep.subr.bf16.mxu1 %v461_v0 }
  0x1e   :  { %225 = vmatpush1.bf16.msra.mxu0 %v435_v10  ;;  %425 = vmatpush1.bf16.msra.mxu1 %v435_v10 }
  0x1f   :  { %226 = vmatprep.subr.bf16.mxu0 %v461_v0  ;;  %417 = vmatprep.subr.bf16.mxu1 %v461_v0 }
  0x22   :  { %227 = vmatpush1.bf16.msra.mxu0 %v436_v11  ;;  %426 = vmatpush1.bf16.msra.mxu1 %v436_v11 }
  0x25   :  { %243 = vmatmul.mubr.bf16.vlgmr.msra.gmra.mrb[0].mxu0 %v437_v12  ;;  %275 = vmatmul.mubr.bf16.vlgmr.msra.gmra.mrb[0].mxu1 %v440_v13  ;;  %v311_v12 = vld [vmem:[%s690_s3 + $0x20] sm:$0xff] }
  0x26   :  { %402 = vmatprep.mubr.msk.bf16.mxu0 %vm185_vm0, %v443_v14  ;;  %406 = vmatprep.mubr.msk.bf16.mxu1 %vm185_vm0, %v445_v15  ;;  %v319_v14 = vld [vmem:[%s690_s3 + $0x60] sm:$0xff] }
  0x2d   :  { %251 = vmatmul.mubr.bf16.gmra.mrb[4].mxu0 %v447_v16  ;;  %283 = vmatmul.mubr.bf16.gmra.mrb[4].mxu1 %v448_v17 }
  0x2e   :  { %403 = vmatprep.mubr.msk.bf16.mxu0 %vm185_vm0, %v449_v18  ;;  %407 = vmatprep.mubr.msk.bf16.mxu1 %vm185_vm0, %v451_v19 }
  0x35   :  { %259 = vmatmul.mubr.bf16.gmra.mrb[8].mxu0 %v453_v20  ;;  %291 = vmatmul.mubr.bf16.gmra.mrb[8].mxu1 %v454_v21  ;;  %v312_v20 = vld [vmem:[%s690_s3 + $0x28] sm:$0xff] }
  0x36   :  { %404 = vmatprep.mubr.msk.bf16.mxu0 %vm185_vm0, %v455_v22  ;;  %408 = vmatprep.mubr.msk.bf16.mxu1 %vm185_vm0, %v457_v23  ;;  %v320_v22 = vld [vmem:[%s690_s3 + $0x68] sm:$0xff] }
  0x3d   :  { %267 = vmatmul.mubr.bf16.gmra.mrb[12].mxu0 %v459_v24  ;;  %299 = vmatmul.mubr.bf16.gmra.mrb[12].mxu1 %v460_v25 }
  0xf8   :  { %v244_v27 = vpop.f32.mrb[0].mxu0  ;;  %v276_v29 = vpop.f32.mrb[0].mxu1 }
  0xf9   :  { %v245_v31 = vadd.f32 %v573_v26, %v244_v27  ;;  %v277_v32 = vadd.f32 %v573_v26, %v276_v29  ;;  %v246_v33 = vpop.f32.mrb[1].mxu0  ;;  %v278_v34 = vpop.f32.mrb[1].mxu1 }
  0xfa   :  { %v247_v35 = vpop.f32.mrb[2].mxu0  ;;  %v279_v37 = vpop.f32.mrb[2].mxu1 }
  0xfb   :  { %v323_v39 = vadd.f32 %v307_v28, %v245_v31  ;;  %v331_v40 = vadd.f32 %v315_v30, %v277_v32  ;;  %v248_v41 = vadd.f32 %v573_v26, %v247_v35  ;;  %v280_v42 = vadd.f32 %v573_v26, %v279_v37  ;;  %v249_v43 = vpop.f32.mrb[3].mxu0  ;;  %v281_v44 = vpop.f32.mrb[3].mxu1  ;;  %v313_v37 = vld [vmem:[%s690_s3 + $0x30] sm:$0xff] }
  0xfd   :  { %v339_v45 = vmax.f32 %v323_v39, 0.0  ;;  %v347_v46 = vmax.f32 %v331_v40, 0.0  ;;  %v324_v47 = vadd.f32 %v308_v36, %v248_v41  ;;  %v332_v48 = vadd.f32 %v316_v38, %v280_v42  ;;  %v321_v39 = vld [vmem:[%s690_s3 + $0x70] sm:$0xff] }
  0xff   :  { %355 = vst [vmem:[%s691_s4] sm:$0xff] %v339_v45  ;;  %363 = vst [vmem:[%s691_s4 + $0x40] sm:$0xff] %v347_v46  ;;  %v340_v49 = vmax.f32 %v324_v47, 0.0  ;;  %v348_v50 = vmax.f32 %v332_v48, 0.0  ;;  %v314_v45 = vld [vmem:[%s690_s3 + $0x38] sm:$0xff] }
 0x100   :  { %v252_v51 = vpop.f32.mrb[4].mxu0  ;;  %v284_v53 = vpop.f32.mrb[4].mxu1  ;;  %v322_v47 = vld [vmem:[%s690_s3 + $0x78] sm:$0xff] }
 0x101   :  { %356 = vst [vmem:[%s691_s4 + $0x8] sm:$0xff] %v340_v49  ;;  %364 = vst [vmem:[%s691_s4 + $0x48] sm:$0xff] %v348_v50  ;;  %v253_v55 = vadd.f32 %v573_v26, %v252_v51  ;;  %v285_v56 = vadd.f32 %v573_v26, %v284_v53  ;;  %v254_v57 = vpop.f32.mrb[5].mxu0  ;;  %v286_v58 = vpop.f32.mrb[5].mxu1 }
 0x102   :  { %v255_v59 = vpop.f32.mrb[6].mxu0  ;;  %v287_v61 = vpop.f32.mrb[6].mxu1 }
 0x103   :  { %v325_v63 = vadd.f32 %v309_v52, %v253_v55  ;;  %v333_v0 = vadd.f32 %v317_v54, %v285_v56  ;;  %v256_v1 = vadd.f32 %v573_v26, %v255_v59  ;;  %v288_v2 = vadd.f32 %v573_v26, %v287_v61  ;;  %v257_v3 = vpop.f32.mrb[7].mxu0  ;;  %v289_v4 = vpop.f32.mrb[7].mxu1 }
 0x105   :  { %v341_v5 = vmax.f32 %v325_v63, 0.0  ;;  %v349_v6 = vmax.f32 %v333_v0, 0.0  ;;  %v326_v7 = vadd.f32 %v310_v60, %v256_v1  ;;  %v334_v8 = vadd.f32 %v318_v62, %v288_v2 }
 0x107   :  { %357 = vst [vmem:[%s691_s4 + $0x10] sm:$0xff] %v341_v5  ;;  %365 = vst [vmem:[%s691_s4 + $0x50] sm:$0xff] %v349_v6  ;;  %v342_v9 = vmax.f32 %v326_v7, 0.0  ;;  %v350_v10 = vmax.f32 %v334_v8, 0.0 }
 0x108   :  { %v260_v11 = vpop.f32.mrb[8].mxu0  ;;  %v292_v13 = vpop.f32.mrb[8].mxu1 }
 0x109   :  { %358 = vst [vmem:[%s691_s4 + $0x18] sm:$0xff] %v342_v9  ;;  %366 = vst [vmem:[%s691_s4 + $0x58] sm:$0xff] %v350_v10  ;;  %v261_v15 = vadd.f32 %v573_v26, %v260_v11  ;;  %v293_v16 = vadd.f32 %v573_v26, %v292_v13  ;;  %v262_v17 = vpop.f32.mrb[9].mxu0  ;;  %v294_v18 = vpop.f32.mrb[9].mxu1 }
 0x10a   :  { %v263_v19 = vpop.f32.mrb[10].mxu0  ;;  %v295_v21 = vpop.f32.mrb[10].mxu1 }
 0x10b   :  { %v327_v23 = vadd.f32 %v311_v12, %v261_v15  ;;  %v335_v24 = vadd.f32 %v319_v14, %v293_v16  ;;  %v264_v25 = vadd.f32 %v573_v26, %v263_v19  ;;  %v296_v27 = vadd.f32 %v573_v26, %v295_v21  ;;  %v265_v28 = vpop.f32.mrb[11].mxu0  ;;  %v297_v29 = vpop.f32.mrb[11].mxu1 }
 0x10d   :  { %v343_v30 = vmax.f32 %v327_v23, 0.0  ;;  %v351_v31 = vmax.f32 %v335_v24, 0.0  ;;  %v328_v32 = vadd.f32 %v312_v20, %v264_v25  ;;  %v336_v33 = vadd.f32 %v320_v22, %v296_v27 }
 0x10f   :  { %359 = vst [vmem:[%s691_s4 + $0x20] sm:$0xff] %v343_v30  ;;  %367 = vst [vmem:[%s691_s4 + $0x60] sm:$0xff] %v351_v31  ;;  %v344_v34 = vmax.f32 %v328_v32, 0.0  ;;  %v352_v35 = vmax.f32 %v336_v33, 0.0 }
 0x110   :  { %v268_v36 = vpop.f32.mrb[12].mxu0  ;;  %v300_v38 = vpop.f32.mrb[12].mxu1 }
 0x111   :  { %360 = vst [vmem:[%s691_s4 + $0x28] sm:$0xff] %v344_v34  ;;  %368 = vst [vmem:[%s691_s4 + $0x68] sm:$0xff] %v352_v35  ;;  %v269_v40 = vadd.f32 %v573_v26, %v268_v36  ;;  %v301_v41 = vadd.f32 %v573_v26, %v300_v38  ;;  %v270_v42 = vpop.f32.mrb[13].mxu0  ;;  %v302_v43 = vpop.f32.mrb[13].mxu1 }
 0x112   :  { %v271_v44 = vpop.f32.mrb[14].mxu0  ;;  %v303_v46 = vpop.f32.mrb[14].mxu1 }
 0x113   :  { %v329_v48 = vadd.f32 %v313_v37, %v269_v40  ;;  %v337_v49 = vadd.f32 %v321_v39, %v301_v41  ;;  %v272_v50 = vadd.f32 %v573_v26, %v271_v44  ;;  %v304_v51 = vadd.f32 %v573_v26, %v303_v46  ;;  %v273_v52 = vpop.f32.mrb[15].mxu0  ;;  %v305_v53 = vpop.f32.mrb[15].mxu1 }
 0x115   :  { %v345_v54 = vmax.f32 %v329_v48, 0.0  ;;  %v353_v55 = vmax.f32 %v337_v49, 0.0  ;;  %v330_v56 = vadd.f32 %v314_v45, %v272_v50  ;;  %v338_v57 = vadd.f32 %v322_v47, %v304_v51 }
 0x117   :  { %361 = vst [vmem:[%s691_s4 + $0x30] sm:$0xff] %v345_v54  ;;  %369 = vst [vmem:[%s691_s4 + $0x70] sm:$0xff] %v353_v55  ;;  %v346_v58 = vmax.f32 %v330_v56, 0.0  ;;  %v354_v59 = vmax.f32 %v338_v57, 0.0 }
 0x119   :  { %362 = vst [vmem:[%s691_s4 + $0x38] sm:$0xff] %v346_v58  ;;  %370 = vst [vmem:[%s691_s4 + $0x78] sm:$0xff] %v354_v59 }

// kernel: cotraining_forward.17
= control target key start
LH: loop header
LB: loop body
LE: loop exit
PB: predicated region body
PF: predicated region fallthrough
CT: control target
= control target key end

     0   :  { %v234_v0 = vmov 0   ;;  %vm116_vm0 = vcmask 130048   ;;  %s309_s1 = inlined_call_operand.vmem [shape: bf16[144,128], index: 1, kind: input, shape index: {}]   ;;  %s310_s0 = inlined_call_operand.vmem [shape: bf16[32,144], index: 0, kind: input, shape index: {}]   ;;  %s311_s2 = inlined_call_operand.vmem [shape: f32[1,128], index: 2, kind: input, shape index: {}]   ;;  %s312_s3 = inlined_call_operand.vmem [shape: f32[32,128], index: 3, kind: output, shape index: {}]  }
   0x1   :  { %123 = vmatprep.subr.bf16.mxu0 %v234_v0  ;;  %200 = vmatprep.subr.bf16.mxu1 %v234_v0  ;;  %v219_v1 = vld [vmem:[%s309_s1] sm:$0xff]   ;;  %v220_v2 = vld [vmem:[%s309_s1 + $0x8] sm:$0xff]   ;;  %v221_v3 = vld [vmem:[%s309_s1 + $0x10] sm:$0xff]  }
   0x2   :  { %124 = vmatpush1.bf16.msra.mxu0 %v219_v1  ;;  %209 = vmatpush1.bf16.msra.mxu1 %v219_v1  ;;  %v222_v4 = vld [vmem:[%s309_s1 + $0x18] sm:$0xff]   ;;  %v230_v5 = vld [vmem:[%s310_s0 + $0x4] ss:$8 sps:$4 sm:$0xff]   ;;  %v225_v9 = vld [vmem:[%s309_s1 + $0x30] sm:$0xff]  }
   0x3   :  { %125 = vmatprep.subr.bf16.mxu0 %v234_v0  ;;  %201 = vmatprep.subr.bf16.mxu1 %v234_v0  ;;  %v233_v6 = vld [vmem:[%s310_s0 + $0x14] ss:$8 sps:$4 sm:$0xff]   ;;  %v223_v7 = vld [vmem:[%s309_s1 + $0x20] sm:$0xff]   ;;  %v224_v8 = vld [vmem:[%s309_s1 + $0x28] sm:$0xff]  }
   0x4   :  { %198 = vmatprep.mubr.msk.bf16.mxu0 %vm116_vm0, %v230_v5  ;;  %199 = vmatprep.mubr.msk.bf16.mxu1 %vm116_vm0, %v233_v6  ;;  %v226_v10 = vld [vmem:[%s309_s1 + $0x38] sm:$0xff]   ;;  %v227_v11 = vld [vmem:[%s309_s1 + $0x40] sm:$0xff]  }
   0x5   :  { %v228_v12 = vld [vmem:[%s310_s0] ss:$8 sps:$4 sm:$0xff]   ;;  %v231_v13 = vld [vmem:[%s310_s0 + $0x10] ss:$8 sps:$4 sm:$0xff]  }
   0x6   :  { %126 = vmatpush1.bf16.msra.mxu0 %v220_v2  ;;  %210 = vmatpush1.bf16.msra.mxu1 %v220_v2  ;;  %v184_v14 = vld [vmem:[%s311_s2] ss:$0 sm:$0xff] }
   0x7   :  { %127 = vmatprep.subr.bf16.mxu0 %v234_v0  ;;  %202 = vmatprep.subr.bf16.mxu1 %v234_v0 }
   0xa   :  { %128 = vmatpush1.bf16.msra.mxu0 %v221_v3  ;;  %211 = vmatpush1.bf16.msra.mxu1 %v221_v3 }
   0xb   :  { %129 = vmatprep.subr.bf16.mxu0 %v234_v0  ;;  %203 = vmatprep.subr.bf16.mxu1 %v234_v0 }
   0xe   :  { %130 = vmatpush1.bf16.msra.mxu0 %v222_v4  ;;  %212 = vmatpush1.bf16.msra.mxu1 %v222_v4 }
   0xf   :  { %131 = vmatprep.subr.bf16.mxu0 %v234_v0  ;;  %204 = vmatprep.subr.bf16.mxu1 %v234_v0 }
  0x12   :  { %132 = vmatpush1.bf16.msra.mxu0 %v223_v7  ;;  %213 = vmatpush1.bf16.msra.mxu1 %v223_v7 }
  0x13   :  { %133 = vmatprep.subr.bf16.mxu0 %v234_v0  ;;  %205 = vmatprep.subr.bf16.mxu1 %v234_v0 }
  0x16   :  { %134 = vmatpush1.bf16.msra.mxu0 %v224_v8  ;;  %214 = vmatpush1.bf16.msra.mxu1 %v224_v8 }
  0x17   :  { %135 = vmatprep.subr.bf16.mxu0 %v234_v0  ;;  %206 = vmatprep.subr.bf16.mxu1 %v234_v0 }
  0x1a   :  { %136 = vmatpush1.bf16.msra.mxu0 %v225_v9  ;;  %215 = vmatpush1.bf16.msra.mxu1 %v225_v9 }
  0x1b   :  { %137 = vmatprep.subr.bf16.mxu0 %v234_v0  ;;  %207 = vmatprep.subr.bf16.mxu1 %v234_v0 }
  0x1e   :  { %138 = vmatpush1.bf16.msra.mxu0 %v226_v10  ;;  %216 = vmatpush1.bf16.msra.mxu1 %v226_v10 }
  0x1f   :  { %139 = vmatprep.subr.bf16.mxu0 %v234_v0  ;;  %208 = vmatprep.subr.bf16.mxu1 %v234_v0 }
  0x22   :  { %140 = vmatpush1.bf16.msra.mxu0 %v227_v11  ;;  %217 = vmatpush1.bf16.msra.mxu1 %v227_v11 }
  0x25   :  { %156 = vmatmul.mubr.bf16.vlgmr.msra.gmra.mrb[0].mxu0 %v228_v12  ;;  %164 = vmatmul.mubr.bf16.vlgmr.msra.gmra.mrb[0].mxu1 %v231_v13 }
  0xf8   :  { %v157_v15 = vpop.f32.mrb[0].mxu0  ;;  %v165_v16 = vpop.f32.mrb[0].mxu1 }
  0xf9   :  { %v158_v17 = vadd.f32 %v184_v14, %v157_v15  ;;  %v166_v18 = vadd.f32 %v184_v14, %v165_v16  ;;  %v159_v19 = vpop.f32.mrb[1].mxu0  ;;  %v167_v20 = vpop.f32.mrb[1].mxu1 }
  0xfa   :  { %v160_v21 = vpop.f32.mrb[2].mxu0  ;;  %v168_v22 = vpop.f32.mrb[2].mxu1 }
  0xfb   :  { %v172_v23 = vmax.f32 %v158_v17, 0.0  ;;  %v174_v24 = vmax.f32 %v166_v18, 0.0  ;;  %v161_v25 = vadd.f32 %v184_v14, %v160_v21  ;;  %v169_v26 = vadd.f32 %v184_v14, %v168_v22  ;;  %v162_v27 = vpop.f32.mrb[3].mxu0  ;;  %v170_v28 = vpop.f32.mrb[3].mxu1 }
  0xfd   :  { %176 = vst [vmem:[%s312_s3] sm:$0xff] %v172_v23  ;;  %178 = vst [vmem:[%s312_s3 + $0x10] sm:$0xff] %v174_v24  ;;  %v173_v29 = vmax.f32 %v161_v25, 0.0  ;;  %v175_v30 = vmax.f32 %v169_v26, 0.0 }
  0xff   :  { %177 = vst [vmem:[%s312_s3 + $0x8] sm:$0xff] %v173_v29  ;;  %179 = vst [vmem:[%s312_s3 + $0x18] sm:$0xff] %v175_v30 }

// kernel: cotraining_forward.16
= control target key start
LH: loop header
LB: loop body
LE: loop exit
PB: predicated region body
PF: predicated region fallthrough
CT: control target
= control target key end

     0   :  { %vm44_vm0 = vcmask 130048   ;;  %s170_s1 = inlined_call_operand.vmem [shape: bf16[16,128], index: 1, kind: input, shape index: {}]   ;;  %s171_s0 = inlined_call_operand.vmem [shape: bf16[32,16], index: 0, kind: input, shape index: {}]   ;;  %s172_s2 = inlined_call_operand.vmem [shape: f32[1,128], index: 2, kind: input, shape index: {}]   ;;  %s173_s3 = inlined_call_operand.vmem [shape: f32[32,128], index: 3, kind: output, shape index: {}]  }
   0x1   :  { %v123_v0 = vld [vmem:[%s170_s1] sm:$0xff]   ;;  %v125_v2 = vld [vmem:[%s171_s0 + $0x8] sm:$0xff]  }
   0x2   :  { %v124_v1 = vld [vmem:[%s171_s0] sm:$0xff]   ;;  %117 = vmatprep.subr.bf16.mxu0 %v123_v0 }
   0x3   :  { %118 = vmatpush3.bf16.msra.mxu0 %v123_v0  ;;  %119 = vmatprep.mubr.msk.bf16.mxu0 %vm44_vm0, %v124_v1  ;;  %v108_v3 = vld [vmem:[%s172_s2] ss:$0 sm:$0xff] }
   0x6   :  { %120 = vmatmul.mubr.msk.bf16.vlgmr.msra.gmra.mrb[0].mxu0 %vm44_vm0, %v125_v2 }
  0xd9   :  { %v121_v4 = vpop.f32.mrb[0].mxu0 }
  0xda   :  { %v94_v5 = vadd.f32 %v121_v4, %v108_v3  ;;  %v85_v6 = vpop.f32.mrb[1].mxu0 }
  0xdb   :  { %v86_v7 = vadd.f32 %v108_v3, %v85_v6  ;;  %v122_v8 = vpop.f32.mrb[2].mxu0 }
  0xdc   :  { %102 = vst [vmem:[%s173_s3 + $0x10] sm:$0xff] %v94_v5  ;;  %v97_v9 = vadd.f32 %v122_v8, %v108_v3  ;;  %v88_v10 = vpop.f32.mrb[3].mxu0 }
  0xdd   :  { %100 = vst [vmem:[%s173_s3] sm:$0xff] %v86_v7  ;;  %v89_v11 = vadd.f32 %v108_v3, %v88_v10 }
  0xde   :  { %103 = vst [vmem:[%s173_s3 + $0x18] sm:$0xff] %v97_v9 }
  0xdf   :  { %101 = vst [vmem:[%s173_s3 + $0x8] sm:$0xff] %v89_v11 }

// kernel: cotraining_forward.18
= control target key start
LH: loop header
LB: loop body
LE: loop exit
PB: predicated region body
PF: predicated region fallthrough
CT: control target
= control target key end

     0   :  { %vm207_vm0 = vcmask 261120   ;;  %s549_s1 = inlined_call_operand.vmem [shape: bf16[288,128], index: 1, kind: input, shape index: {}]   ;;  %s550_s0 = inlined_call_operand.vmem [shape: bf16[32,288], index: 0, kind: input, shape index: {}]   ;;  %s551_s2 = inlined_call_operand.vmem [shape: f32[1,128], index: 2, kind: input, shape index: {}]   ;;  %s552_s3 = inlined_call_operand.vmem [shape: f32[32,128], index: 3, kind: input, shape index: {}]   ;;  %s553_s4 = inlined_call_operand.vmem [shape: f32[32,128], index: 4, kind: output, shape index: {}]  }
   0x1   :  { %v399_v0 = vld [vmem:[%s549_s1 + $0x40] sm:$0xff]   ;;  %v401_v2 = vld [vmem:[%s549_s1 + $0x48] sm:$0xff]   ;;  %v403_v4 = vld [vmem:[%s549_s1 + $0x50] sm:$0xff]  }
   0x2   :  { %v400_v1 = vld [vmem:[%s549_s1] sm:$0xff]   ;;  %359 = vmatprep.subr.bf16.mxu0 %v399_v0  ;;  %v402_v3 = vld [vmem:[%s549_s1 + $0x8] sm:$0xff]   ;;  %v404_v5 = vld [vmem:[%s549_s1 + $0x10] sm:$0xff]  }
   0x3   :  { %360 = vmatpush3.bf16.msra.mxu0 %v400_v1  ;;  %v405_v6 = vld [vmem:[%s549_s1 + $0x58] sm:$0xff]   ;;  %v407_v8 = vld [vmem:[%s549_s1 + $0x60] sm:$0xff]   ;;  %v409_v11 = vld [vmem:[%s549_s1 + $0x68] sm:$0xff]  }
   0x4   :  { %361 = vmatprep.subr.bf16.mxu0 %v401_v2  ;;  %v406_v7 = vld [vmem:[%s549_s1 + $0x18] sm:$0xff]   ;;  %v408_v9 = vld [vmem:[%s549_s1 + $0x20] sm:$0xff]   ;;  %v410_v12 = vld [vmem:[%s549_s1 + $0x28] sm:$0xff]  }
   0x5   :  { %v414_v10 = vld [vmem:[%s549_s1 + $0x80] sm:$0xff]   ;;  %v411_v13 = vld [vmem:[%s549_s1 + $0x70] sm:$0xff]   ;;  %v419_v15 = vld [vmem:[%s549_s1 + $0x88] sm:$0xff]  }
   0x6   :  { %391 = vmatprep.subr.bf16.mxu1 %v414_v10  ;;  %v418_v14 = vld [vmem:[%s550_s0 + $0x4] ss:$12 sps:$4 sm:$0xff]   ;;  %v420_v16 = vld [vmem:[%s550_s0 + $0x8] ss:$12 sps:$4 sm:$0xff]   ;;  %v421_v17 = vld [vmem:[%s550_s0 + $0x20] ss:$12 sps:$4 sm:$0xff]  }
   0x7   :  { %362 = vmatpush3.bf16.msra.mxu0 %v402_v3  ;;  %392 = vmatpush3.bf16.msra.mxu1 %v414_v10  ;;  %v412_v18 = vld [vmem:[%s549_s1 + $0x30] sm:$0xff]   ;;  %v413_v19 = vld [vmem:[%s549_s1 + $0x78] sm:$0xff]   ;;  %v416_v21 = vld [vmem:[%s550_s0] ss:$12 sps:$4 sm:$0xff]  }
   0x8   :  { %363 = vmatprep.subr.bf16.mxu0 %v403_v4  ;;  %246 = vmatprep.mubr.bf16.mxu0 %v418_v14  ;;  %v415_v20 = vld [vmem:[%s549_s1 + $0x38] sm:$0xff]   ;;  %v332_v30 = vld [vmem:[%s551_s2] ss:$0 sm:$0xff]  ;;  %v313_v39 = vld [vmem:[%s552_s3 + $0x8] sm:$0xff] }
   0x9   :  { %393 = vmatprep.subr.bf16.mxu1 %v419_v15  ;;  %395 = vmatprep.mubr.msk.bf16.mxu1 %vm207_vm0, %v420_v16  ;;  %v422_v22 = vld [vmem:[%s550_s0 + $0x1c] ss:$12 sps:$4 sm:$0xff]   ;;  %v424_v23 = vld [vmem:[%s550_s0 + $0x18] ss:$12 sps:$4 sm:$0xff]   ;;  %v314_v52 = vld [vmem:[%s552_s3 + $0x10] sm:$0xff] }
   0xa   :  { %v312_v36 = vld [vmem:[%s552_s3] sm:$0xff]  ;;  %v315_v55 = vld [vmem:[%s552_s3 + $0x18] sm:$0xff] }
   0xb   :  { %364 = vmatpush3.bf16.msra.mxu0 %v404_v5  ;;  %394 = vmatpush3.bf16.msra.mxu1 %v419_v15 }
   0xc   :  { %365 = vmatprep.subr.bf16.mxu0 %v405_v6 }
   0xe   :  { %396 = vmatmul.mubr.msk.bf16.vlgmr.msra.gmra.mrb[0].mxu1 %vm207_vm0, %v421_v17 }
   0xf   :  { %366 = vmatpush3.bf16.msra.mxu0 %v406_v7 }
  0x10   :  { %367 = vmatprep.subr.bf16.mxu0 %v407_v8 }
  0x13   :  { %368 = vmatpush3.bf16.msra.mxu0 %v408_v9 }
  0x14   :  { %369 = vmatprep.subr.bf16.mxu0 %v409_v11 }
  0x17   :  { %370 = vmatpush3.bf16.msra.mxu0 %v410_v12 }
  0x18   :  { %371 = vmatprep.subr.bf16.mxu0 %v411_v13 }
  0x1b   :  { %372 = vmatpush3.bf16.msra.mxu0 %v412_v18 }
  0x1c   :  { %373 = vmatprep.subr.bf16.mxu0 %v413_v19 }
  0x1f   :  { %374 = vmatpush3.bf16.msra.mxu0 %v415_v20 }
  0x22   :  { %247 = vmatmul.mubr.bf16.vlgmr.msra.gmra.mrb[0].mxu0 %v416_v21 }
  0x23   :  { %254 = vmatprep.mubr.bf16.mxu0 %v422_v22 }
  0x2a   :  { %255 = vmatmul.mubr.bf16.gmra.mrb[4].mxu0 %v424_v23 }
  0xe1   :  { %v397_v24 = vpop.f32.mrb[0].mxu1 }
  0xe2   :  { %v297_v25 = vpop.f32.mrb[1].mxu1 }
  0xe3   :  { %v398_v26 = vpop.f32.mrb[2].mxu1 }
  0xe4   :  { %v300_v27 = vpop.f32.mrb[3].mxu1 }
  0xf5   :  { %v375_v28 = vpop.f32.mrb[0].mxu0 }
  0xf6   :  { %v376_v29 = vpop.f32.mrb[1].mxu0 }
  0xf7   :  { %v377_v31 = vadd.f32 %v376_v29, %v375_v28  ;;  %v378_v32 = vpop.f32.mrb[2].mxu0 }
  0xf8   :  { %v379_v33 = vpop.f32.mrb[3].mxu0 }
  0xf9   :  { %v380_v34 = vadd.f32 %v379_v33, %v378_v32  ;;  %v249_v35 = vadd.f32 %v377_v31, %v332_v30 }
  0xfb   :  { %v298_v37 = vadd.f32 %v297_v25, %v249_v35  ;;  %v252_v38 = vadd.f32 %v380_v34, %v332_v30 }
  0xfd   :  { %v316_v40 = vadd.f32 %v312_v36, %v298_v37  ;;  %v301_v41 = vadd.f32 %v300_v27, %v252_v38  ;;  %v381_v42 = vpop.f32.mrb[4].mxu0 }
  0xfe   :  { %v382_v43 = vpop.f32.mrb[5].mxu0 }
  0xff   :  { %v320_v44 = vmax.f32 %v316_v40, 0.0  ;;  %v317_v45 = vadd.f32 %v313_v39, %v301_v41  ;;  %v383_v46 = vadd.f32 %v382_v43, %v381_v42  ;;  %v384_v47 = vpop.f32.mrb[6].mxu0 }
 0x100   :  { %v385_v48 = vpop.f32.mrb[7].mxu0 }
 0x101   :  { %324 = vst [vmem:[%s553_s4] sm:$0xff] %v320_v44  ;;  %v321_v49 = vmax.f32 %v317_v45, 0.0  ;;  %v257_v50 = vadd.f32 %v383_v46, %v332_v30  ;;  %v386_v51 = vadd.f32 %v385_v48, %v384_v47 }
 0x103   :  { %325 = vst [vmem:[%s553_s4 + $0x8] sm:$0xff] %v321_v49  ;;  %v306_v53 = vadd.f32 %v397_v24, %v257_v50  ;;  %v260_v54 = vadd.f32 %v386_v51, %v332_v30 }
 0x105   :  { %v318_v56 = vadd.f32 %v314_v52, %v306_v53  ;;  %v309_v57 = vadd.f32 %v398_v26, %v260_v54 }
 0x107   :  { %v322_v58 = vmax.f32 %v318_v56, 0.0  ;;  %v319_v59 = vadd.f32 %v315_v55, %v309_v57 }
 0x109   :  { %326 = vst [vmem:[%s553_s4 + $0x10] sm:$0xff] %v322_v58  ;;  %v323_v60 = vmax.f32 %v319_v59, 0.0 }
 0x10b   :  { %327 = vst [vmem:[%s553_s4 + $0x18] sm:$0xff] %v323_v60 }

// kernel: cotraining_forward.20
= control target key start
LH: loop header
LB: loop body
LE: loop exit
PB: predicated region body
PF: predicated region fallthrough
CT: control target
= control target key end

     0   :  { %v347_v1 = vmov 0.0   ;;  %vm348_vm0 = vmmov 0   ;;  %vm178_vm1 = vcmask 261120   ;;  %s435_s1 = inlined_call_operand.vmem [shape: bf16[288,128], index: 1, kind: input, shape index: {}]   ;;  %s436_s0 = inlined_call_operand.vmem [shape: bf16[8,288], index: 0, kind: input, shape index: {}]   ;;  %s437_s2 = inlined_call_operand.vmem [shape: f32[1,128], index: 2, kind: input, shape index: {}]   ;;  %s438_s3 = inlined_call_operand.vmem [shape: f32[8,128], index: 3, kind: output, shape index: {}]  }
   0x1   :  { %v326_v0 = vld [vmem:[%s435_s1 + $0x40] sm:$0xff]   ;;  %316 = vmatprep.subr.bf16.mxu1 %v347_v1  ;;  %320 = vmatprep.mubr.msk.bf16.mxu1 %vm348_vm0, %v347_v1  ;;  %v328_v3 = vld [vmem:[%s435_s1 + $0x48] sm:$0xff]   ;;  %v330_v5 = vld [vmem:[%s435_s1 + $0x50] sm:$0xff]  }
   0x2   :  { %v327_v2 = vld [vmem:[%s435_s1] sm:$0xff]   ;;  %291 = vmatprep.subr.bf16.mxu0 %v326_v0  ;;  %v329_v4 = vld [vmem:[%s435_s1 + $0x8] sm:$0xff]   ;;  %v331_v6 = vld [vmem:[%s435_s1 + $0x10] sm:$0xff]  }
   0x3   :  { %292 = vmatpush3.bf16.msra.mxu0 %v327_v2  ;;  %v332_v7 = vld [vmem:[%s435_s1 + $0x58] sm:$0xff]   ;;  %v334_v9 = vld [vmem:[%s435_s1 + $0x60] sm:$0xff]   ;;  %v336_v12 = vld [vmem:[%s435_s1 + $0x68] sm:$0xff]  }
   0x4   :  { %293 = vmatprep.subr.bf16.mxu0 %v328_v3  ;;  %v333_v8 = vld [vmem:[%s435_s1 + $0x18] sm:$0xff]   ;;  %v340_v10 = vld [vmem:[%s435_s1 + $0x80] sm:$0xff]   ;;  %v346_v15 = vld [vmem:[%s435_s1 + $0x88] sm:$0xff]  }
   0x5   :  { %v335_v11 = vld [vmem:[%s435_s1 + $0x20] sm:$0xff]   ;;  %317 = vmatpush3.bf16.msra.mxu1 %v340_v10  ;;  %v337_v16 = vld [vmem:[%s435_s1 + $0x28] sm:$0xff]   ;;  %v338_v17 = vld [vmem:[%s435_s1 + $0x70] sm:$0xff]  }
   0x6   :  { %318 = vmatprep.subr.bf16.mxu1 %v347_v1  ;;  %v15_v13 = vld [vmem:[%s436_s0] sm:$0xff]  ;;  %v345_v18 = vld [vmem:[%s436_s0 + $0x8] ss:$0 sps:$4 sm:$0xff]   ;;  %v339_v19 = vld [vmem:[%s435_s1 + $0x30] sm:$0xff]  }
   0x7   :  { %294 = vmatpush3.bf16.msra.mxu0 %v329_v4  ;;  %v270_v14 = vcombine.high %v15_v13, %v15_v13  ;;  %v341_v20 = vld [vmem:[%s435_s1 + $0x78] sm:$0xff]   ;;  %v269_v22 = vcombine.low %v15_v13, %v15_v13  ;;  %v268_v29 = vld [vmem:[%s437_s2] ss:$0 sm:$0xff] }
   0x8   :  { %295 = vmatprep.subr.bf16.mxu0 %v330_v5  ;;  %v342_v21 = vld [vmem:[%s435_s1 + $0x38] sm:$0xff]  }
   0x9   :  { %214 = vmatprep.mubr.bf16.mxu0 %v270_v14  ;;  %319 = vmatpush3.bf16.msra.mxu1 %v346_v15 }
   0xb   :  { %296 = vmatpush3.bf16.msra.mxu0 %v331_v6 }
   0xc   :  { %297 = vmatprep.subr.bf16.mxu0 %v332_v7  ;;  %321 = vmatmul.mubr.msk.bf16.vlgmr.msra.gmra.mrb[0].mxu1 %vm178_vm1, %v345_v18 }
   0xf   :  { %298 = vmatpush3.bf16.msra.mxu0 %v333_v8 }
  0x10   :  { %299 = vmatprep.subr.bf16.mxu0 %v334_v9 }
  0x13   :  { %300 = vmatpush3.bf16.msra.mxu0 %v335_v11 }
  0x14   :  { %301 = vmatprep.subr.bf16.mxu0 %v336_v12 }
  0x17   :  { %302 = vmatpush3.bf16.msra.mxu0 %v337_v16 }
  0x18   :  { %303 = vmatprep.subr.bf16.mxu0 %v338_v17 }
  0x1b   :  { %304 = vmatpush3.bf16.msra.mxu0 %v339_v19 }
  0x1c   :  { %305 = vmatprep.subr.bf16.mxu0 %v341_v20 }
  0x1f   :  { %306 = vmatpush3.bf16.msra.mxu0 %v342_v21 }
  0x22   :  { %215 = vmatmul.mubr.bf16.vlgmr.msra.gmra.mrb[0].mxu0 %v269_v22 }
  0xdf   :  { %v256_v23 = vpop.f32.mrb[0].mxu1 }
  0xe0   :  { %v322_v24 = vpop.f32.mrb[1].mxu1 }
  0xe1   :  { %v259_v25 = vpop.f32.mrb[2].mxu1 }
  0xe2   :  { %v323_v26 = vpop.f32.mrb[3].mxu1 }
  0xf5   :  { %v307_v27 = vpop.f32.mrb[0].mxu0 }
  0xf6   :  { %v308_v28 = vpop.f32.mrb[1].mxu0 }
  0xf7   :  { %v309_v30 = vadd.f32 %v308_v28, %v307_v27  ;;  %v310_v31 = vpop.f32.mrb[2].mxu0 }
  0xf8   :  { %v311_v32 = vpop.f32.mrb[3].mxu0 }
  0xf9   :  { %v217_v33 = vadd.f32 %v309_v30, %v268_v29 }
  0xfb   :  { %v257_v34 = vadd.f32 %v256_v23, %v217_v33 }
  0xfd   :  { %v262_v35 = vmax.f32 %v257_v34, 0.0 }
  0xff   :  { %263 = vst [vmem:[%s438_s3] sm:$0xff] %v262_v35 }

// kernel: cotraining_forward.19
= control target key start
LH: loop header
LB: loop body
LE: loop exit
PB: predicated region body
PF: predicated region fallthrough
CT: control target
= control target key end

     0   :  { %v107_v0 = vmov 0.0   ;;  %vm108_vm0 = vmmov 0   ;;  %vm39_vm1 = vcmask 261120   ;;  %s144_s1 = inlined_call_operand.vmem [shape: bf16[32,128], index: 1, kind: input, shape index: {}]   ;;  %s145_s0 = inlined_call_operand.vmem [shape: bf16[8,32], index: 0, kind: input, shape index: {}]   ;;  %s146_s2 = inlined_call_operand.vmem [shape: f32[1,128], index: 2, kind: input, shape index: {}]   ;;  %s147_s3 = inlined_call_operand.vmem [shape: f32[8,128], index: 3, kind: output, shape index: {}]  }
   0x1   :  { %95 = vmatprep.subr.bf16.mxu0 %v107_v0  ;;  %v105_v1 = vld [vmem:[%s144_s1] sm:$0xff]   ;;  %99 = vmatprep.mubr.msk.bf16.mxu0 %vm108_vm0, %v107_v0  ;;  %v106_v2 = vld [vmem:[%s144_s1 + $0x8] sm:$0xff]  }
   0x2   :  { %96 = vmatpush3.bf16.msra.mxu0 %v105_v1  ;;  %v15_v3 = vld [vmem:[%s145_s0] sm:$0xf] }
   0x3   :  { %97 = vmatprep.subr.bf16.mxu0 %v107_v0  ;;  %v88_v4 = vld [vmem:[%s146_s2] ss:$0 sm:$0xff] }
   0x6   :  { %98 = vmatpush3.bf16.msra.mxu0 %v106_v2 }
   0x9   :  { %100 = vmatmul.mubr.msk.bf16.vlgmr.msra.gmra.mrb[0].mxu0 %vm39_vm1, %v15_v3 }
  0xdc   :  { %v77_v5 = vpop.f32.mrb[0].mxu0 }
  0xdd   :  { %v78_v6 = vadd.f32 %v88_v4, %v77_v5  ;;  %v101_v7 = vpop.f32.mrb[1].mxu0 }
  0xde   :  { %v80_v8 = vpop.f32.mrb[2].mxu0 }
  0xdf   :  { %83 = vst [vmem:[%s147_s3] sm:$0xff] %v78_v6  ;;  %v102_v9 = vpop.f32.mrb[3].mxu0 }

// kernel: cotraining_forward.22
= control target key start
LH: loop header
LB: loop body
LE: loop exit
PB: predicated region body
PF: predicated region fallthrough
CT: control target
= control target key end

     0   :  { %v607_v35 = vmov 0.0   ;;  %vm608_vm0 = vmmov 0   ;;  %vm330_vm1 = vcmask 523264   ;;  %s752_s1 = inlined_call_operand.vmem [shape: bf16[576,128], index: 1, kind: input, shape index: {}]   ;;  %s753_s0 = inlined_call_operand.vmem [shape: bf16[8,576], index: 0, kind: input, shape index: {}]   ;;  %s754_s2 = inlined_call_operand.vmem [shape: f32[1,128], index: 2, kind: input, shape index: {}]   ;;  %s755_s3 = inlined_call_operand.vmem [shape: f32[8,128], index: 3, kind: output, shape index: {}]  }
   0x1   :  { %v566_v0 = vld [vmem:[%s752_s1 + $0x40] sm:$0xff]   ;;  %v570_v4 = vld [vmem:[%s752_s1 + $0x48] sm:$0xff]   ;;  %v574_v8 = vld [vmem:[%s752_s1 + $0x50] sm:$0xff]  }
   0x2   :  { %v567_v1 = vld [vmem:[%s752_s1] sm:$0xff]   ;;  %503 = vmatprep.subr.bf16.mxu0 %v566_v0  ;;  %v571_v5 = vld [vmem:[%s752_s1 + $0x8] sm:$0xff]   ;;  %v575_v9 = vld [vmem:[%s752_s1 + $0x10] sm:$0xff]  }
   0x3   :  { %v568_v2 = vld [vmem:[%s752_s1 + $0xc0] sm:$0xff]   ;;  %504 = vmatpush3.bf16.msra.mxu0 %v567_v1  ;;  %v572_v6 = vld [vmem:[%s752_s1 + $0xc8] sm:$0xff]   ;;  %v576_v10 = vld [vmem:[%s752_s1 + $0xd0] sm:$0xff]  }
   0x4   :  { %v569_v3 = vld [vmem:[%s752_s1 + $0x80] sm:$0xff]   ;;  %525 = vmatprep.subr.bf16.mxu1 %v568_v2  ;;  %505 = vmatprep.subr.bf16.mxu0 %v570_v4  ;;  %v573_v7 = vld [vmem:[%s752_s1 + $0x88] sm:$0xff]   ;;  %v577_v11 = vld [vmem:[%s752_s1 + $0x90] sm:$0xff]  }
   0x5   :  { %526 = vmatpush3.bf16.msra.mxu1 %v569_v3  ;;  %v578_v12 = vld [vmem:[%s752_s1 + $0x58] sm:$0xff]   ;;  %v582_v16 = vld [vmem:[%s752_s1 + $0x60] sm:$0xff]   ;;  %v586_v20 = vld [vmem:[%s752_s1 + $0x68] sm:$0xff]  }
   0x6   :  { %527 = vmatprep.subr.bf16.mxu1 %v572_v6  ;;  %v579_v13 = vld [vmem:[%s752_s1 + $0x18] sm:$0xff]   ;;  %v583_v17 = vld [vmem:[%s752_s1 + $0x20] sm:$0xff]   ;;  %v587_v21 = vld [vmem:[%s752_s1 + $0x28] sm:$0xff]  }
   0x7   :  { %506 = vmatpush3.bf16.msra.mxu0 %v571_v5  ;;  %v580_v14 = vld [vmem:[%s752_s1 + $0xd8] sm:$0xff]   ;;  %v584_v18 = vld [vmem:[%s752_s1 + $0xe0] sm:$0xff]   ;;  %v588_v22 = vld [vmem:[%s752_s1 + $0xe8] sm:$0xff]  }
   0x8   :  { %507 = vmatprep.subr.bf16.mxu0 %v574_v8  ;;  %v581_v15 = vld [vmem:[%s752_s1 + $0x98] sm:$0xff]   ;;  %v585_v19 = vld [vmem:[%s752_s1 + $0xa0] sm:$0xff]   ;;  %v589_v23 = vld [vmem:[%s752_s1 + $0xa8] sm:$0xff]  }
   0x9   :  { %528 = vmatpush3.bf16.msra.mxu1 %v573_v7  ;;  %v590_v24 = vld [vmem:[%s752_s1 + $0x70] sm:$0xff]   ;;  %v594_v28 = vld [vmem:[%s752_s1 + $0x78] sm:$0xff]   ;;  %v15_v31 = vld [vmem:[%s753_s0] sm:$0xff] }
   0xa   :  { %529 = vmatprep.subr.bf16.mxu1 %v576_v10  ;;  %v591_v25 = vld [vmem:[%s752_s1 + $0x30] sm:$0xff]   ;;  %v595_v29 = vld [vmem:[%s752_s1 + $0x38] sm:$0xff]   ;;  %v461_v32 = vcombine.low %v15_v31, %v15_v31  ;;  %v462_v33 = vcombine.high %v15_v31, %v15_v31  ;;  %v16_v36 = vld [vmem:[%s753_s0 + $0x8] sm:$0xff] }
   0xb   :  { %508 = vmatpush3.bf16.msra.mxu0 %v575_v9  ;;  %v592_v26 = vld [vmem:[%s752_s1 + $0xf0] sm:$0xff]   ;;  %v596_v30 = vld [vmem:[%s752_s1 + $0xf8] sm:$0xff]   ;;  %v463_v37 = vcombine.low %v16_v36, %v16_v36  ;;  %v464_v38 = vcombine.high %v16_v36, %v16_v36  ;;  %v603_v39 = vld [vmem:[%s752_s1 + $0x100] sm:$0xff]  }
   0xc   :  { %509 = vmatprep.subr.bf16.mxu0 %v578_v12  ;;  %v593_v27 = vld [vmem:[%s752_s1 + $0xb0] sm:$0xff]   ;;  %v600_v34 = vld [vmem:[%s752_s1 + $0xb8] sm:$0xff]   ;;  %366 = vmatprep.mubr.bf16.mxu0 %v462_v33  ;;  %v604_v40 = vld [vmem:[%s752_s1 + $0x108] sm:$0xff]  }
   0xd   :  { %530 = vmatpush3.bf16.msra.mxu1 %v577_v11  ;;  %406 = vmatprep.mubr.bf16.mxu1 %v464_v38  ;;  %v605_v41 = vld [vmem:[%s752_s1 + $0x110] sm:$0xff]   ;;  %v606_v42 = vld [vmem:[%s752_s1 + $0x118] sm:$0xff]   ;;  %v460_v45 = vld [vmem:[%s754_s2] ss:$0 sm:$0xff] }
   0xe   :  { %531 = vmatprep.subr.bf16.mxu1 %v580_v14  ;;  %v599_v43 = vld [vmem:[%s753_s0 + $0x10] ss:$0 sps:$4 sm:$0xff]  }
   0xf   :  { %510 = vmatpush3.bf16.msra.mxu0 %v579_v13 }
  0x10   :  { %511 = vmatprep.subr.bf16.mxu0 %v582_v16 }
  0x11   :  { %532 = vmatpush3.bf16.msra.mxu1 %v581_v15 }
  0x12   :  { %533 = vmatprep.subr.bf16.mxu1 %v584_v18 }
  0x13   :  { %512 = vmatpush3.bf16.msra.mxu0 %v583_v17 }
  0x14   :  { %513 = vmatprep.subr.bf16.mxu0 %v586_v20 }
  0x15   :  { %534 = vmatpush3.bf16.msra.mxu1 %v585_v19 }
  0x16   :  { %535 = vmatprep.subr.bf16.mxu1 %v588_v22 }
  0x17   :  { %514 = vmatpush3.bf16.msra.mxu0 %v587_v21 }
  0x18   :  { %515 = vmatprep.subr.bf16.mxu0 %v590_v24 }
  0x19   :  { %536 = vmatpush3.bf16.msra.mxu1 %v589_v23 }
  0x1a   :  { %537 = vmatprep.subr.bf16.mxu1 %v592_v26 }
  0x1b   :  { %516 = vmatpush3.bf16.msra.mxu0 %v591_v25 }
  0x1c   :  { %517 = vmatprep.subr.bf16.mxu0 %v594_v28 }
  0x1d   :  { %538 = vmatpush3.bf16.msra.mxu1 %v593_v27 }
  0x1e   :  { %539 = vmatprep.subr.bf16.mxu1 %v596_v30 }
  0x1f   :  { %518 = vmatpush3.bf16.msra.mxu0 %v595_v29 }
  0x20   :  { %552 = vmatprep.subr.bf16.mxu0 %v607_v35 }
  0x21   :  { %540 = vmatpush3.bf16.msra.mxu1 %v600_v34 }
  0x22   :  { %367 = vmatmul.mubr.bf16.vlgmr.msra.gmra.mrb[0].mxu0 %v461_v32 }
  0x23   :  { %553 = vmatpush3.bf16.msra.mxu0 %v603_v39  ;;  %560 = vmatprep.mubr.msk.bf16.mxu0 %vm608_vm0, %v607_v35 }
  0x24   :  { %407 = vmatmul.mubr.bf16.vlgmr.msra.gmra.mrb[0].mxu1 %v463_v37  ;;  %554 = vmatprep.subr.bf16.mxu0 %v607_v35 }
  0x27   :  { %555 = vmatpush3.bf16.msra.mxu0 %v604_v40 }
  0x28   :  { %556 = vmatprep.subr.bf16.mxu0 %v607_v35 }
  0x2b   :  { %557 = vmatpush3.bf16.msra.mxu0 %v605_v41 }
  0x2c   :  { %558 = vmatprep.subr.bf16.mxu0 %v607_v35 }
  0x2f   :  { %559 = vmatpush3.bf16.msra.mxu0 %v606_v42 }
  0x32   :  { %561 = vmatmul.mubr.msk.bf16.vlgmr.msra.gmra.mrb[4].mxu0 %vm330_vm1, %v599_v43 }
  0xf5   :  { %v519_v44 = vpop.f32.mrb[0].mxu0 }
  0xf6   :  { %v520_v46 = vpop.f32.mrb[1].mxu0 }
  0xf7   :  { %v521_v47 = vadd.f32 %v520_v46, %v519_v44  ;;  %v522_v48 = vpop.f32.mrb[2].mxu0  ;;  %v541_v49 = vpop.f32.mrb[0].mxu1 }
  0xf8   :  { %v523_v50 = vpop.f32.mrb[3].mxu0  ;;  %v542_v51 = vpop.f32.mrb[1].mxu1 }
  0xf9   :  { %v369_v52 = vadd.f32 %v521_v47, %v460_v45  ;;  %v543_v53 = vadd.f32 %v542_v51, %v541_v49  ;;  %v544_v54 = vpop.f32.mrb[2].mxu1 }
  0xfa   :  { %v545_v55 = vpop.f32.mrb[3].mxu1 }
  0xfb   :  { %v409_v56 = vadd.f32 %v543_v53, %v369_v52 }
 0x105   :  { %v448_v57 = vpop.f32.mrb[4].mxu0 }
 0x106   :  { %v449_v58 = vadd.f32 %v448_v57, %v409_v56  ;;  %v562_v59 = vpop.f32.mrb[5].mxu0 }
 0x107   :  { %v451_v60 = vpop.f32.mrb[6].mxu0 }
 0x108   :  { %v454_v61 = vmax.f32 %v449_v58, 0.0  ;;  %v563_v62 = vpop.f32.mrb[7].mxu0 }
 0x10a   :  { %455 = vst [vmem:[%s755_s3] sm:$0xff] %v454_v61 }

// kernel: cotraining_forward.21
= control target key start
LH: loop header
LB: loop body
LE: loop exit
PB: predicated region body
PF: predicated region fallthrough
CT: control target
= control target key end

     0   :  { %v612_v35 = vmov 0.0   ;;  %vm613_vm0 = vmmov 0   ;;  %vm333_vm1 = vcmask 523264   ;;  %s765_s1 = inlined_call_operand.vmem [shape: bf16[576,128], index: 1, kind: input, shape index: {}]   ;;  %s766_s0 = inlined_call_operand.vmem [shape: bf16[8,576], index: 0, kind: input, shape index: {}]   ;;  %s767_s2 = inlined_call_operand.vmem [shape: f32[1,128], index: 2, kind: input, shape index: {}]   ;;  %s768_s3 = inlined_call_operand.vmem [shape: f32[8,128], index: 3, kind: input, shape index: {}]   ;;  %s769_s4 = inlined_call_operand.vmem [shape: f32[8,128], index: 4, kind: output, shape index: {}]  }
   0x1   :  { %v571_v0 = vld [vmem:[%s765_s1 + $0x40] sm:$0xff]   ;;  %v575_v4 = vld [vmem:[%s765_s1 + $0x48] sm:$0xff]   ;;  %v579_v8 = vld [vmem:[%s765_s1 + $0x50] sm:$0xff]  }
   0x2   :  { %v572_v1 = vld [vmem:[%s765_s1] sm:$0xff]   ;;  %508 = vmatprep.subr.bf16.mxu0 %v571_v0  ;;  %v576_v5 = vld [vmem:[%s765_s1 + $0x8] sm:$0xff]   ;;  %v580_v9 = vld [vmem:[%s765_s1 + $0x10] sm:$0xff]  }
   0x3   :  { %v573_v2 = vld [vmem:[%s765_s1 + $0xc0] sm:$0xff]   ;;  %509 = vmatpush3.bf16.msra.mxu0 %v572_v1  ;;  %v577_v6 = vld [vmem:[%s765_s1 + $0xc8] sm:$0xff]   ;;  %v581_v10 = vld [vmem:[%s765_s1 + $0xd0] sm:$0xff]  }
   0x4   :  { %v574_v3 = vld [vmem:[%s765_s1 + $0x80] sm:$0xff]   ;;  %530 = vmatprep.subr.bf16.mxu1 %v573_v2  ;;  %510 = vmatprep.subr.bf16.mxu0 %v575_v4  ;;  %v578_v7 = vld [vmem:[%s765_s1 + $0x88] sm:$0xff]   ;;  %v582_v11 = vld [vmem:[%s765_s1 + $0x90] sm:$0xff]  }
   0x5   :  { %531 = vmatpush3.bf16.msra.mxu1 %v574_v3  ;;  %v583_v12 = vld [vmem:[%s765_s1 + $0x58] sm:$0xff]   ;;  %v587_v16 = vld [vmem:[%s765_s1 + $0x60] sm:$0xff]   ;;  %v591_v20 = vld [vmem:[%s765_s1 + $0x68] sm:$0xff]  }
   0x6   :  { %532 = vmatprep.subr.bf16.mxu1 %v577_v6  ;;  %v584_v13 = vld [vmem:[%s765_s1 + $0x18] sm:$0xff]   ;;  %v588_v17 = vld [vmem:[%s765_s1 + $0x20] sm:$0xff]   ;;  %v592_v21 = vld [vmem:[%s765_s1 + $0x28] sm:$0xff]  }
   0x7   :  { %511 = vmatpush3.bf16.msra.mxu0 %v576_v5  ;;  %v585_v14 = vld [vmem:[%s765_s1 + $0xd8] sm:$0xff]   ;;  %v589_v18 = vld [vmem:[%s765_s1 + $0xe0] sm:$0xff]   ;;  %v593_v22 = vld [vmem:[%s765_s1 + $0xe8] sm:$0xff]  }
   0x8   :  { %512 = vmatprep.subr.bf16.mxu0 %v579_v8  ;;  %v586_v15 = vld [vmem:[%s765_s1 + $0x98] sm:$0xff]   ;;  %v590_v19 = vld [vmem:[%s765_s1 + $0xa0] sm:$0xff]   ;;  %v594_v23 = vld [vmem:[%s765_s1 + $0xa8] sm:$0xff]  }
   0x9   :  { %533 = vmatpush3.bf16.msra.mxu1 %v578_v7  ;;  %v595_v24 = vld [vmem:[%s765_s1 + $0x70] sm:$0xff]   ;;  %v599_v28 = vld [vmem:[%s765_s1 + $0x78] sm:$0xff]   ;;  %v18_v31 = vld [vmem:[%s766_s0] sm:$0xff] }
   0xa   :  { %534 = vmatprep.subr.bf16.mxu1 %v581_v10  ;;  %v596_v25 = vld [vmem:[%s765_s1 + $0x30] sm:$0xff]   ;;  %v600_v29 = vld [vmem:[%s765_s1 + $0x38] sm:$0xff]   ;;  %v466_v32 = vcombine.low %v18_v31, %v18_v31  ;;  %v467_v33 = vcombine.high %v18_v31, %v18_v31  ;;  %v19_v36 = vld [vmem:[%s766_s0 + $0x8] sm:$0xff] }
   0xb   :  { %513 = vmatpush3.bf16.msra.mxu0 %v580_v9  ;;  %v597_v26 = vld [vmem:[%s765_s1 + $0xf0] sm:$0xff]   ;;  %v601_v30 = vld [vmem:[%s765_s1 + $0xf8] sm:$0xff]   ;;  %v468_v37 = vcombine.low %v19_v36, %v19_v36  ;;  %v469_v38 = vcombine.high %v19_v36, %v19_v36  ;;  %v608_v39 = vld [vmem:[%s765_s1 + $0x100] sm:$0xff]  }
   0xc   :  { %514 = vmatprep.subr.bf16.mxu0 %v583_v12  ;;  %v598_v27 = vld [vmem:[%s765_s1 + $0xb0] sm:$0xff]   ;;  %v605_v34 = vld [vmem:[%s765_s1 + $0xb8] sm:$0xff]   ;;  %369 = vmatprep.mubr.bf16.mxu0 %v467_v33  ;;  %v609_v40 = vld [vmem:[%s765_s1 + $0x108] sm:$0xff]  }
   0xd   :  { %535 = vmatpush3.bf16.msra.mxu1 %v582_v11  ;;  %409 = vmatprep.mubr.bf16.mxu1 %v469_v38  ;;  %v610_v41 = vld [vmem:[%s765_s1 + $0x110] sm:$0xff]   ;;  %v611_v42 = vld [vmem:[%s765_s1 + $0x118] sm:$0xff]   ;;  %v465_v45 = vld [vmem:[%s767_s2] ss:$0 sm:$0xff] }
   0xe   :  { %536 = vmatprep.subr.bf16.mxu1 %v585_v14  ;;  %v604_v43 = vld [vmem:[%s766_s0 + $0x10] ss:$0 sps:$4 sm:$0xff]   ;;  %v457_v58 = vld [vmem:[%s768_s3] sm:$0xff] }
   0xf   :  { %515 = vmatpush3.bf16.msra.mxu0 %v584_v13 }
  0x10   :  { %516 = vmatprep.subr.bf16.mxu0 %v587_v16 }
  0x11   :  { %537 = vmatpush3.bf16.msra.mxu1 %v586_v15 }
  0x12   :  { %538 = vmatprep.subr.bf16.mxu1 %v589_v18 }
  0x13   :  { %517 = vmatpush3.bf16.msra.mxu0 %v588_v17 }
  0x14   :  { %518 = vmatprep.subr.bf16.mxu0 %v591_v20 }
  0x15   :  { %539 = vmatpush3.bf16.msra.mxu1 %v590_v19 }
  0x16   :  { %540 = vmatprep.subr.bf16.mxu1 %v593_v22 }
  0x17   :  { %519 = vmatpush3.bf16.msra.mxu0 %v592_v21 }
  0x18   :  { %520 = vmatprep.subr.bf16.mxu0 %v595_v24 }
  0x19   :  { %541 = vmatpush3.bf16.msra.mxu1 %v594_v23 }
  0x1a   :  { %542 = vmatprep.subr.bf16.mxu1 %v597_v26 }
  0x1b   :  { %521 = vmatpush3.bf16.msra.mxu0 %v596_v25 }
  0x1c   :  { %522 = vmatprep.subr.bf16.mxu0 %v599_v28 }
  0x1d   :  { %543 = vmatpush3.bf16.msra.mxu1 %v598_v27 }
  0x1e   :  { %544 = vmatprep.subr.bf16.mxu1 %v601_v30 }
  0x1f   :  { %523 = vmatpush3.bf16.msra.mxu0 %v600_v29 }
  0x20   :  { %557 = vmatprep.subr.bf16.mxu0 %v612_v35 }
  0x21   :  { %545 = vmatpush3.bf16.msra.mxu1 %v605_v34 }
  0x22   :  { %370 = vmatmul.mubr.bf16.vlgmr.msra.gmra.mrb[0].mxu0 %v466_v32 }
  0x23   :  { %558 = vmatpush3.bf16.msra.mxu0 %v608_v39  ;;  %565 = vmatprep.mubr.msk.bf16.mxu0 %vm613_vm0, %v612_v35 }
  0x24   :  { %410 = vmatmul.mubr.bf16.vlgmr.msra.gmra.mrb[0].mxu1 %v468_v37  ;;  %559 = vmatprep.subr.bf16.mxu0 %v612_v35 }
  0x27   :  { %560 = vmatpush3.bf16.msra.mxu0 %v609_v40 }
  0x28   :  { %561 = vmatprep.subr.bf16.mxu0 %v612_v35 }
  0x2b   :  { %562 = vmatpush3.bf16.msra.mxu0 %v610_v41 }
  0x2c   :  { %563 = vmatprep.subr.bf16.mxu0 %v612_v35 }
  0x2f   :  { %564 = vmatpush3.bf16.msra.mxu0 %v611_v42 }
  0x32   :  { %566 = vmatmul.mubr.msk.bf16.vlgmr.msra.gmra.mrb[4].mxu0 %vm333_vm1, %v604_v43 }
  0xf5   :  { %v524_v44 = vpop.f32.mrb[0].mxu0 }
  0xf6   :  { %v525_v46 = vpop.f32.mrb[1].mxu0 }
  0xf7   :  { %v526_v47 = vadd.f32 %v525_v46, %v524_v44  ;;  %v527_v48 = vpop.f32.mrb[2].mxu0  ;;  %v546_v49 = vpop.f32.mrb[0].mxu1 }
  0xf8   :  { %v528_v50 = vpop.f32.mrb[3].mxu0  ;;  %v547_v51 = vpop.f32.mrb[1].mxu1 }
  0xf9   :  { %v372_v52 = vadd.f32 %v526_v47, %v465_v45  ;;  %v548_v53 = vadd.f32 %v547_v51, %v546_v49  ;;  %v549_v54 = vpop.f32.mrb[2].mxu1 }
  0xfa   :  { %v550_v55 = vpop.f32.mrb[3].mxu1 }
  0xfb   :  { %v412_v56 = vadd.f32 %v548_v53, %v372_v52 }
 0x105   :  { %v451_v57 = vpop.f32.mrb[4].mxu0 }
 0x106   :  { %v452_v59 = vadd.f32 %v451_v57, %v412_v56  ;;  %v567_v60 = vpop.f32.mrb[5].mxu0 }
 0x107   :  { %v454_v61 = vpop.f32.mrb[6].mxu0 }
 0x108   :  { %v458_v62 = vadd.f32 %v457_v58, %v452_v59  ;;  %v568_v63 = vpop.f32.mrb[7].mxu0 }
 0x10a   :  { %v459_v0 = vmax.f32 %v458_v62, 0.0 }
 0x10c   :  { %460 = vst [vmem:[%s769_s4] sm:$0xff] %v459_v0 }

// kernel: cotraining_forward.23
= control target key start
LH: loop header
LB: loop body
LE: loop exit
PB: predicated region body
PF: predicated region fallthrough
CT: control target
= control target key end

     0   :  { %v648_v35 = vmov 0.0   ;;  %vm649_vm0 = vmmov 0   ;;  %s811_s0 = inlined_call_operand.vmem [shape: bf16[8,576], index: 0, kind: input, shape index: {}]   ;;  %s812_s1 = inlined_call_operand.vmem [shape: bf16[576,128], index: 1, kind: input, shape index: {}]   ;;  %s813_s2 = inlined_call_operand.vmem [shape: f32[1,128], index: 2, kind: input, shape index: {}]   ;;  %s814_s3 = inlined_call_operand.vmem [shape: f32[8,128], index: 3, kind: input, shape index: {}]   ;;  %s815_s4 = inlined_call_operand.hbm [shape: f32[8,128], index: 4, kind: output, shape index: {}]  }
   0x1   :  { %v583_v0 = vld [vmem:[%s812_s1 + $0x40] sm:$0xff]   ;;  %v587_v4 = vld [vmem:[%s812_s1 + $0x48] sm:$0xff]   ;;  %v591_v8 = vld [vmem:[%s812_s1 + $0x50] sm:$0xff]  }
   0x2   :  { %v584_v1 = vld [vmem:[%s812_s1] sm:$0xff]   ;;  %519 = vmatprep.subr.bf16.mxu0 %v583_v0  ;;  %v588_v5 = vld [vmem:[%s812_s1 + $0x8] sm:$0xff]   ;;  %v592_v9 = vld [vmem:[%s812_s1 + $0x10] sm:$0xff]  }
   0x3   :  { %v585_v2 = vld [vmem:[%s812_s1 + $0xc0] sm:$0xff]   ;;  %520 = vmatpush3.bf16.msra.mxu0 %v584_v1  ;;  %v589_v6 = vld [vmem:[%s812_s1 + $0xc8] sm:$0xff]   ;;  %v593_v10 = vld [vmem:[%s812_s1 + $0xd0] sm:$0xff]  }
   0x4   :  { %v586_v3 = vld [vmem:[%s812_s1 + $0x80] sm:$0xff]   ;;  %541 = vmatprep.subr.bf16.mxu1 %v585_v2  ;;  %521 = vmatprep.subr.bf16.mxu0 %v587_v4  ;;  %v590_v7 = vld [vmem:[%s812_s1 + $0x88] sm:$0xff]   ;;  %v594_v11 = vld [vmem:[%s812_s1 + $0x90] sm:$0xff]  }
   0x5   :  { %542 = vmatpush3.bf16.msra.mxu1 %v586_v3  ;;  %v595_v12 = vld [vmem:[%s812_s1 + $0x58] sm:$0xff]   ;;  %v599_v16 = vld [vmem:[%s812_s1 + $0x60] sm:$0xff]   ;;  %v603_v20 = vld [vmem:[%s812_s1 + $0x68] sm:$0xff]  }
   0x6   :  { %543 = vmatprep.subr.bf16.mxu1 %v589_v6  ;;  %v596_v13 = vld [vmem:[%s812_s1 + $0x18] sm:$0xff]   ;;  %v600_v17 = vld [vmem:[%s812_s1 + $0x20] sm:$0xff]   ;;  %v604_v21 = vld [vmem:[%s812_s1 + $0x28] sm:$0xff]  }
   0x7   :  { %522 = vmatpush3.bf16.msra.mxu0 %v588_v5  ;;  %v597_v14 = vld [vmem:[%s812_s1 + $0xd8] sm:$0xff]   ;;  %v601_v18 = vld [vmem:[%s812_s1 + $0xe0] sm:$0xff]   ;;  %v605_v22 = vld [vmem:[%s812_s1 + $0xe8] sm:$0xff]  }
   0x8   :  { %523 = vmatprep.subr.bf16.mxu0 %v591_v8  ;;  %v598_v15 = vld [vmem:[%s812_s1 + $0x98] sm:$0xff]   ;;  %v602_v19 = vld [vmem:[%s812_s1 + $0xa0] sm:$0xff]   ;;  %v606_v23 = vld [vmem:[%s812_s1 + $0xa8] sm:$0xff]  }
   0x9   :  { %544 = vmatpush3.bf16.msra.mxu1 %v590_v7  ;;  %v607_v24 = vld [vmem:[%s812_s1 + $0x70] sm:$0xff]   ;;  %v611_v28 = vld [vmem:[%s812_s1 + $0x78] sm:$0xff]   ;;  %v19_v31 = vld [vmem:[%s811_s0] sm:$0xff] }
   0xa   :  { %545 = vmatprep.subr.bf16.mxu1 %v593_v10  ;;  %v608_v25 = vld [vmem:[%s812_s1 + $0x30] sm:$0xff]   ;;  %v612_v29 = vld [vmem:[%s812_s1 + $0x38] sm:$0xff]   ;;  %v477_v32 = vcombine.low %v19_v31, %v19_v31  ;;  %v478_v33 = vcombine.high %v19_v31, %v19_v31  ;;  %v20_v36 = vld [vmem:[%s811_s0 + $0x8] sm:$0xff] }
   0xb   :  { %524 = vmatpush3.bf16.msra.mxu0 %v592_v9  ;;  %v609_v26 = vld [vmem:[%s812_s1 + $0xf0] sm:$0xff]   ;;  %v613_v30 = vld [vmem:[%s812_s1 + $0xf8] sm:$0xff]   ;;  %v479_v37 = vcombine.low %v20_v36, %v20_v36  ;;  %v480_v38 = vcombine.high %v20_v36, %v20_v36  ;;  %v619_v39 = vld [vmem:[%s812_s1 + $0x100] sm:$0xff]  }
   0xc   :  { %525 = vmatprep.subr.bf16.mxu0 %v595_v12  ;;  %v610_v27 = vld [vmem:[%s812_s1 + $0xb0] sm:$0xff]   ;;  %v616_v34 = vld [vmem:[%s812_s1 + $0xb8] sm:$0xff]   ;;  %370 = vmatprep.mubr.bf16.mxu0 %v478_v33  ;;  %v620_v40 = vld [vmem:[%s812_s1 + $0x108] sm:$0xff]  }
   0xd   :  { %546 = vmatpush3.bf16.msra.mxu1 %v594_v11  ;;  %410 = vmatprep.mubr.bf16.mxu1 %v480_v38 }
   0xe   :  { %547 = vmatprep.subr.bf16.mxu1 %v597_v14 }
   0xf   :  { %526 = vmatpush3.bf16.msra.mxu0 %v596_v13 }
  0x10   :  { %527 = vmatprep.subr.bf16.mxu0 %v599_v16 }
  0x11   :  { %548 = vmatpush3.bf16.msra.mxu1 %v598_v15 }
  0x12   :  { %549 = vmatprep.subr.bf16.mxu1 %v601_v18 }
  0x13   :  { %528 = vmatpush3.bf16.msra.mxu0 %v600_v17 }
  0x14   :  { %529 = vmatprep.subr.bf16.mxu0 %v603_v20 }
  0x15   :  { %550 = vmatpush3.bf16.msra.mxu1 %v602_v19 }
  0x16   :  { %551 = vmatprep.subr.bf16.mxu1 %v605_v22 }
  0x17   :  { %530 = vmatpush3.bf16.msra.mxu0 %v604_v21 }
  0x18   :  { %531 = vmatprep.subr.bf16.mxu0 %v607_v24 }
  0x19   :  { %552 = vmatpush3.bf16.msra.mxu1 %v606_v23 }
  0x1a   :  { %553 = vmatprep.subr.bf16.mxu1 %v609_v26 }
  0x1b   :  { %532 = vmatpush3.bf16.msra.mxu0 %v608_v25 }
  0x1c   :  { %533 = vmatprep.subr.bf16.mxu0 %v611_v28 }
  0x1d   :  { %554 = vmatpush3.bf16.msra.mxu1 %v610_v27 }
  0x1e   :  { %555 = vmatprep.subr.bf16.mxu1 %v613_v30 }
  0x1f   :  { %534 = vmatpush3.bf16.msra.mxu0 %v612_v29 }
  0x20   :  { %568 = vmatprep.subr.bf16.mxu0 %v648_v35 }
  0x21   :  { %556 = vmatpush3.bf16.msra.mxu1 %v616_v34 }
  0x22   :  { %371 = vmatmul.mubr.bf16.vlgmr.msra.gmra.mrb[0].mxu0 %v477_v32 }
  0x23   :  { %569 = vmatpush3.bf16.msra.mxu0 %v619_v39  ;;  %576 = vmatprep.mubr.msk.bf16.mxu0 %vm649_vm0, %v648_v35 }
  0x24   :  { %411 = vmatmul.mubr.bf16.vlgmr.msra.gmra.mrb[0].mxu1 %v479_v37  ;;  %570 = vmatprep.subr.bf16.mxu0 %v648_v35 }
  0x25   :  { %9 = vsyncpa [#allocation3], 0  ;;  %v621_v41 = vld [vmem:[%s812_s1 + $0x110] sm:$0xff]   ;;  %v622_v42 = vld [vmem:[%s812_s1 + $0x118] sm:$0xff]   ;;  %vm334_vm1 = vcmask 523264  }
  0x26   :  { %v623_v43 = vld [vmem:[%s811_s0 + $0x10] ss:$0 sps:$4 sm:$0xff]   ;;  %v476_v45 = vld [vmem:[%s813_s2] ss:$0 sm:$0xff]  ;;  %s650_s2 = smov [#allocation2]  }
  0x27   :  { %571 = vmatpush3.bf16.msra.mxu0 %v620_v40  ;;  %v458_v58 = vld [vmem:[%s814_s3] sm:$0xff]  ;;  %s468_s17 = sshll.u32 %s650_s2, 4  ;;  %s469_s17 = int_to_ptr.vmem [resolvable:$true] %s468_s17 }
  0x28   :  { %572 = vmatprep.subr.bf16.mxu0 %v648_v35  ;;  %s624_s18 = scalar_lea.vmem %s469_s17, 128  ;;  %p629_p1 = scmp.lt.s32.totalorder %s469_s17, %s469_s17 }
  0x29   :  { %p625_p0 = scmp.ne.s32.totalorder %s469_s17, %s624_s18  ;;  %p630_p2 = scmp.lt.s32.totalorder %s624_s18, %s624_s18 }
  0x2b   :  { %573 = vmatpush3.bf16.msra.mxu0 %v621_v41  ;;  %p631_p3 = por %p630_p2, %p629_p1 }
  0x2c   :  { %574 = vmatprep.subr.bf16.mxu0 %v648_v35 }
  0x2d   :  { %p632_p4 = pnand %p631_p3, %p625_p0 }
  0x2f   :  { %575 = vmatpush3.bf16.msra.mxu0 %v622_v42 }
  0x32   :  { %577 = vmatmul.mubr.msk.bf16.vlgmr.msra.gmra.mrb[4].mxu0 %vm334_vm1, %v623_v43 }
  0xf5   :  { %v535_v44 = vpop.f32.mrb[0].mxu0 }
  0xf6   :  { %v536_v46 = vpop.f32.mrb[1].mxu0 }
  0xf7   :  { %v537_v47 = vadd.f32 %v536_v46, %v535_v44  ;;  %v538_v48 = vpop.f32.mrb[2].mxu0  ;;  %v557_v49 = vpop.f32.mrb[0].mxu1 }
  0xf8   :  { %v539_v50 = vpop.f32.mrb[3].mxu0  ;;  %v558_v51 = vpop.f32.mrb[1].mxu1 }
  0xf9   :  { %v373_v52 = vadd.f32 %v537_v47, %v476_v45  ;;  %v559_v53 = vadd.f32 %v558_v51, %v557_v49  ;;  %v560_v54 = vpop.f32.mrb[2].mxu1 }
  0xfa   :  { %v561_v55 = vpop.f32.mrb[3].mxu1 }
  0xfb   :  { %v413_v56 = vadd.f32 %v559_v53, %v373_v52 }
 0x105   :  { %v452_v57 = vpop.f32.mrb[4].mxu0 }
 0x106   :  { %v453_v59 = vadd.f32 %v452_v57, %v413_v56  ;;  %v578_v60 = vpop.f32.mrb[5].mxu0 }
 0x107   :  { %v455_v61 = vpop.f32.mrb[6].mxu0 }
 0x108   :  { %v459_v62 = vadd.f32 %v458_v58, %v453_v59  ;;  %v579_v63 = vpop.f32.mrb[7].mxu0 }
 0x10a   :  { %v460_v0 = vmax.f32 %v459_v62, 0.0 }
 0x10c   :  { %461 = vst [vmem:[#allocation2] sm:$0xff] %v460_v0 }
 0x10d   :  { %635 = shalt.err (!%p632_p4)
}
 0x10e   :  { %s636_s3 = scalar_lea.hbm %s815_s4, 128 }
 0x10f   :  { %p637_p5 = scmp.ne.s32.totalorder %s815_s4, %s636_s3  ;;  %p640_p6 = scmp.lt.u32.totalorder %s636_s3, %s815_s4 }
 0x111   :  { %p642_p7 = pnand %p640_p6, %p637_p5 }
 0x113   :  { %645 = shalt.err (!%p642_p7)
}
 0x114   :  { %471 = dma.vmem_to_hbm [thread:$0]  %s469_s17, 128, %s815_s4, [#allocation3]  }
 0x115   :  { %646 = dma.done.wait [#allocation3], 128  }
 0x116   :  { %647 = vsyncadd [#allocation3], 4294967168 }
 0x117   :  { %475 = vsyncpa [#allocation3], 1 }

</bundles_post_ra>
